<compile_context>
chip_gen: v6e
topology: v6e:2x2x1
jax: 0.10.0
libtpu: 0.0.40
codegen_flags: <defaults>
</compile_context>

<pallas_src>
import math

import jax
import jax.numpy as jnp
from jax.experimental import pallas as pl
from jax.experimental.pallas import tpu as pltpu

LANE = 128


def _round_up(x, m):
    return (x + m - 1) // m * m


def _choose_tile_m(n, requested=None):
    n_al = _round_up(max(n, 1), 8)
    if requested is not None:
        tile = _round_up(requested, 8)
    elif n_al <= 1024:
        # Tiny-graph path: 2 row tiles so v7x's 2 TensorCores both get work;
        # the extra grid step costs ~0.35us on single-TC chips (v5e/v6e).
        tile = _round_up((n_al + 1) // 2, 8)
    else:
        # Large-N path: big tiles approach the HBM roofline; the working set
        # (double-buffered activations + all weights) stays well under VMEM.
        tile = 512
    return max(8, min(tile, n_al))


# ----------------------------------------------------------------------------
# Pallas kernel: whole BuildnetDec_Edge stack fused (all Linear layers)
# ----------------------------------------------------------------------------
def _make_fused_mlp_kernel(relu_flags):
    relu_flags = tuple(bool(r) for r in relu_flags)
    n_layers = len(relu_flags)

    def kernel(x_ref, w0_ref, wrest_ref, shift_ref, o_ref):
        # Layer 0: un-padded K=32 input straight from HBM; bf16 MXU, f32 acc.
        h = jnp.dot(x_ref[...].astype(jnp.bfloat16), w0_ref[...],
                    preferred_element_type=jnp.float32)
        h = h + shift_ref[0:1, :]          # folded (bias + BN) shift, f32
        if relu_flags[0]:
            h = jnp.maximum(h, 0.0)
        # Remaining layers: 128x128 padded bf16 weights, zero-padded lanes
        # stay exactly zero through every layer.
        for l in range(1, n_layers):
            h = jnp.dot(h.astype(jnp.bfloat16), wrest_ref[l - 1],
                        preferred_element_type=jnp.float32)
            h = h + shift_ref[l:l + 1, :]
            if relu_flags[l]:
                h = jnp.maximum(h, 0.0)
        # Store only the real output columns (narrow, un-padded output array).
        o_ref[...] = h[:, :o_ref.shape[1]].astype(o_ref.dtype)

    return kernel


def buildnet_dec_edge_forward(node_features, params, *, tile_m=None):
    """Run the whole BuildnetDec_Edge stack in one Pallas kernel.

    node_features : [N, C_in] f32 (read un-padded straight from HBM)
    params        : output of prepare_fused_params(...)
    """
    w0, w_rest, shifts, relu_flags, out_channels = params
    n, c_in = node_features.shape
    assert w0.shape[0] == c_in, (w0.shape, c_in)

    tile_m = _choose_tile_m(n, tile_m)
    n_tiles = pl.cdiv(n, tile_m)           # partial last tile: OOB rows dropped

    kernel = _make_fused_mlp_kernel(relu_flags)

    out = pl.pallas_call(
        kernel,
        out_shape=jax.ShapeDtypeStruct((n, out_channels), node_features.dtype),
        grid_spec=pl.GridSpec(
            grid=(n_tiles,),
            in_specs=[
                pl.BlockSpec((tile_m, c_in), lambda i: (i, 0)),       # x tile
                pl.BlockSpec(w0.shape, lambda i: (0, 0)),             # W0
                pl.BlockSpec(w_rest.shape, lambda i: (0, 0, 0)),      # W1..L-1
                pl.BlockSpec(shifts.shape, lambda i: (0, 0)),         # shifts
            ],
            out_specs=pl.BlockSpec((tile_m, out_channels), lambda i: (i, 0)),
        ),
        compiler_params=pltpu.CompilerParams(
            dimension_semantics=("parallel",)),
    )(node_features, w0, w_rest, shifts)

    return out


# ----------------------------------------------------------------------------
# Parameter construction (PyTorch-default-style init, eval-mode BatchNorm)
# ----------------------------------------------------------------------------
def _init_linear(key, c_in, c_out):
    kw, kb = jax.random.split(key)
    bound = 1.0 / math.sqrt(c_in)
    w = jax.random.uniform(kw, (c_in, c_out), jnp.float32, -bound, bound)
    b = jax.random.uniform(kb, (c_out,), jnp.float32, -bound, bound)
    return w, b


def build_gnn_node_layers(key, in_c, hidden_c, out_c, num_hidden,
                          normalization, last_act, eps=1e-5):
    """Return the list of un-padded layer dicts for one GNN_Node block."""
    dims = [in_c] + [hidden_c] * num_hidden + [out_c]
    num_layers = len(dims) - 1
    keys = jax.random.split(key, num_layers)
    layers = []
    for l in range(num_layers):
        w, b = _init_linear(keys[l], dims[l], dims[l + 1])
        is_last = (l == num_layers - 1)
        act = (not is_last) or last_act
        if act and normalization == "batch":
            # eval-mode BatchNorm1d (running_mean=0, running_var=1, gamma=1,
            # beta=0 for a fresh init); fold: scale=g/sqrt(v+eps),
            # shift=beta - mean*scale.  Formula holds for trained stats too.
            gamma = jnp.ones((dims[l + 1],), jnp.float32)
            beta = jnp.zeros((dims[l + 1],), jnp.float32)
            mean = jnp.zeros((dims[l + 1],), jnp.float32)
            var = jnp.ones((dims[l + 1],), jnp.float32)
            scale = gamma / jnp.sqrt(var + eps)
            shift = beta - mean * scale
        else:
            scale = jnp.ones((dims[l + 1],), jnp.float32)
            shift = jnp.zeros((dims[l + 1],), jnp.float32)
        layers.append(dict(w=w, b=b, scale=scale, shift=shift, relu=bool(act)))
    return layers


def prepare_fused_params(all_layers):
    """Fold BN scale into W (f32, before bf16 cast), bias into shift; pad
    channels to 128 lanes; consolidate into 3 arrays (+relu flags)."""
    assert len(all_layers) >= 2
    L = len(all_layers)
    dims = ([lyr["w"].shape[1] for lyr in all_layers]
            + [lyr["w"].shape[0] for lyr in all_layers[1:]])
    c_pad = _round_up(max(dims), LANE)
    out_channels = all_layers[-1]["w"].shape[1]
    relu_flags = tuple(bool(lyr["relu"]) for lyr in all_layers)

    def fold(lyr):
        # (x@W + b)*scale + shift == x@(W*scale) + (b*scale + shift)
        w_f = lyr["w"] * lyr["scale"][None, :]
        t_f = lyr["b"] * lyr["scale"] + lyr["shift"]
        return w_f, t_f

    # Layer 0: keep K un-padded so x is read from HBM without padding.
    w0_f, t0 = fold(all_layers[0])
    c_in0, c_out0 = w0_f.shape
    w0 = (jnp.zeros((c_in0, c_pad), jnp.float32)
          .at[:, :c_out0].set(w0_f).astype(jnp.bfloat16))

    # Layers 1..L-1 stacked into one bf16 slab; shifts stacked into one f32.
    w_rest = jnp.zeros((L - 1, c_pad, c_pad), jnp.float32)
    shifts = jnp.zeros((L, c_pad), jnp.float32).at[0, :c_out0].set(t0)
    for l in range(1, L):
        w_f, t_f = fold(all_layers[l])
        ci, co = w_f.shape
        w_rest = w_rest.at[l - 1, :ci, :co].set(w_f)
        shifts = shifts.at[l, :co].set(t_f)
    w_rest = w_rest.astype(jnp.bfloat16)

    return w0, w_rest, shifts, relu_flags, out_channels


# ----------------------------------------------------------------------------
# Pure-JAX reference with identical numerics (scale folded in f32, bf16 W,
# f32 accumulation) — matches the kernel bit-for-bit on the real columns.
# ----------------------------------------------------------------------------
def _reference_forward(node_features, all_layers):
    h = node_features.astype(jnp.float32)
    for lyr in all_layers:
        w_fold = (lyr["w"] * lyr["scale"][None, :]).astype(jnp.bfloat16)
        shift_f = lyr["b"] * lyr["scale"] + lyr["shift"]
        h = jnp.dot(h.astype(jnp.bfloat16), w_fold,
                    preferred_element_type=jnp.float32)
        h = h + shift_f[None, :]
        if lyr["relu"]:
            h = jnp.maximum(h, 0.0)
    return h


if __name__ == "__main__":
    key = jax.random.PRNGKey(0)
    k_x, k_m0, k_m1 = jax.random.split(key, 3)

    # modelmeta.mlp_channels equivalent (two GNN_Node updates):
    #   update 0: in=32, hidden=64, out=48, num_hidden=1
    #   update 1: in=48, hidden=64, out=16, num_hidden=2
    # normalization = 'batch', last activation flag = True
    N = 500  # not a multiple of the row tile -> exercises the partial last tile
    node_features = jax.random.normal(k_x, (N, 32), jnp.float32)

    all_layers = (
        build_gnn_node_layers(k_m0, 32, 64, 48, 1, "batch", True)
        + build_gnn_node_layers(k_m1, 48, 64, 16, 2, "batch", True)
    )
    params = prepare_fused_params(all_layers)
    out_channels = params[-1]

    out = buildnet_dec_edge_forward(node_features, params)
    out = jax.block_until_ready(out)

    ref = _reference_forward(node_features, all_layers)
    assert out.shape == (N, out_channels), out.shape
    assert jnp.allclose(out, ref, atol=1e-3, rtol=1e-3), "mismatch vs reference"

    print("KERNEL_OK")
</pallas_src>

<mosaic_0001>
module attributes {stable_mosaic.version = 11 : i64} {
  func.func @kernel(%arg0: i32, %arg1: memref<256x32xf32, #tpu.memory_space<vmem>>, %arg2: memref<32x128xbf16, #tpu.memory_space<vmem>>, %arg3: memref<4x128x128xbf16, #tpu.memory_space<vmem>>, %arg4: memref<5x128xf32, #tpu.memory_space<vmem>>, %arg5: memref<256x16xf32, #tpu.memory_space<vmem>>) attributes {dimension_semantics = [#tpu.dimension_semantics<parallel>], iteration_bounds = array<i64: 2>, scalar_prefetch = 0 : i64, scratch_operands = 0 : i64, tpu.core_type = #tpu.core_type<tc>, window_params = [{transform_indices = @transform_0, window_bounds = array<i64: 256, 32>}, {pipeline_mode = #tpu.pipeline_mode<synchronous>, transform_indices = @transform_1, window_bounds = array<i64: 32, 128>}, {pipeline_mode = #tpu.pipeline_mode<synchronous>, transform_indices = @transform_2, window_bounds = array<i64: 4, 128, 128>}, {pipeline_mode = #tpu.pipeline_mode<synchronous>, transform_indices = @transform_3, window_bounds = array<i64: 5, 128>}, {transform_indices = @transform_4, window_bounds = array<i64: 256, 16>}]} {
    %c0 = arith.constant 0 : index
    %c0_0 = arith.constant 0 : index
    %0 = vector.load %arg1[%c0, %c0_0] : memref<256x32xf32, #tpu.memory_space<vmem>>, vector<256x32xf32>
    %1 = arith.truncf %0 : vector<256x32xf32> to vector<256x32xbf16>
    %c0_1 = arith.constant 0 : index
    %c0_2 = arith.constant 0 : index
    %2 = vector.load %arg2[%c0_1, %c0_2] : memref<32x128xbf16, #tpu.memory_space<vmem>>, vector<32x128xbf16>
    %cst = arith.constant dense<0.000000e+00> : vector<256x128xf32>
    %3 = tpu.matmul %1, %2, %cst {dimension_numbers = #tpu.dot_dimension_numbers<[1], [0], [0], [1], [0, 0, 1, 1], [], []>} : vector<256x32xbf16>, vector<32x128xbf16>, vector<256x128xf32> -> vector<256x128xf32>
    %c0_3 = arith.constant 0 : index
    %c0_4 = arith.constant 0 : index
    %4 = vector.load %arg4[%c0_3, %c0_4] : memref<5x128xf32, #tpu.memory_space<vmem>>, vector<1x128xf32>
    %5 = vector.broadcast %4 : vector<1x128xf32> to vector<256x128xf32>
    %6 = arith.addf %3, %5 : vector<256x128xf32>
    %cst_5 = arith.constant 0.000000e+00 : f32
    %7 = vector.broadcast %cst_5 : f32 to vector<256x128xf32>
    %8 = arith.maximumf %6, %7 : vector<256x128xf32>
    %9 = arith.truncf %8 : vector<256x128xf32> to vector<256x128xbf16>
    %c0_6 = arith.constant 0 : index
    %c0_7 = arith.constant 0 : index
    %c0_8 = arith.constant 0 : index
    %10 = vector.load %arg3[%c0_6, %c0_7, %c0_8] : memref<4x128x128xbf16, #tpu.memory_space<vmem>>, vector<1x128x128xbf16>
    %11 = vector.shape_cast %10 : vector<1x128x128xbf16> to vector<128x128xbf16>
    %cst_9 = arith.constant dense<0.000000e+00> : vector<256x128xf32>
    %12 = tpu.matmul %9, %11, %cst_9 {dimension_numbers = #tpu.dot_dimension_numbers<[1], [0], [0], [1], [0, 0, 1, 1], [], []>} : vector<256x128xbf16>, vector<128x128xbf16>, vector<256x128xf32> -> vector<256x128xf32>
    %c1 = arith.constant 1 : index
    %c0_10 = arith.constant 0 : index
    %13 = vector.load %arg4[%c1, %c0_10] : memref<5x128xf32, #tpu.memory_space<vmem>>, vector<1x128xf32>
    %14 = vector.broadcast %13 : vector<1x128xf32> to vector<256x128xf32>
    %15 = arith.addf %12, %14 : vector<256x128xf32>
    %cst_11 = arith.constant 0.000000e+00 : f32
    %16 = vector.broadcast %cst_11 : f32 to vector<256x128xf32>
    %17 = arith.maximumf %15, %16 : vector<256x128xf32>
    %18 = arith.truncf %17 : vector<256x128xf32> to vector<256x128xbf16>
    %c1_12 = arith.constant 1 : index
    %c0_13 = arith.constant 0 : index
    %c0_14 = arith.constant 0 : index
    %19 = vector.load %arg3[%c1_12, %c0_13, %c0_14] : memref<4x128x128xbf16, #tpu.memory_space<vmem>>, vector<1x128x128xbf16>
    %20 = vector.shape_cast %19 : vector<1x128x128xbf16> to vector<128x128xbf16>
    %cst_15 = arith.constant dense<0.000000e+00> : vector<256x128xf32>
    %21 = tpu.matmul %18, %20, %cst_15 {dimension_numbers = #tpu.dot_dimension_numbers<[1], [0], [0], [1], [0, 0, 1, 1], [], []>} : vector<256x128xbf16>, vector<128x128xbf16>, vector<256x128xf32> -> vector<256x128xf32>
    %c2 = arith.constant 2 : index
    %c0_16 = arith.constant 0 : index
    %22 = vector.load %arg4[%c2, %c0_16] : memref<5x128xf32, #tpu.memory_space<vmem>>, vector<1x128xf32>
    %23 = vector.broadcast %22 : vector<1x128xf32> to vector<256x128xf32>
    %24 = arith.addf %21, %23 : vector<256x128xf32>
    %cst_17 = arith.constant 0.000000e+00 : f32
    %25 = vector.broadcast %cst_17 : f32 to vector<256x128xf32>
    %26 = arith.maximumf %24, %25 : vector<256x128xf32>
    %27 = arith.truncf %26 : vector<256x128xf32> to vector<256x128xbf16>
    %c2_18 = arith.constant 2 : index
    %c0_19 = arith.constant 0 : index
    %c0_20 = arith.constant 0 : index
    %28 = vector.load %arg3[%c2_18, %c0_19, %c0_20] : memref<4x128x128xbf16, #tpu.memory_space<vmem>>, vector<1x128x128xbf16>
    %29 = vector.shape_cast %28 : vector<1x128x128xbf16> to vector<128x128xbf16>
    %cst_21 = arith.constant dense<0.000000e+00> : vector<256x128xf32>
    %30 = tpu.matmul %27, %29, %cst_21 {dimension_numbers = #tpu.dot_dimension_numbers<[1], [0], [0], [1], [0, 0, 1, 1], [], []>} : vector<256x128xbf16>, vector<128x128xbf16>, vector<256x128xf32> -> vector<256x128xf32>
    %c3 = arith.constant 3 : index
    %c0_22 = arith.constant 0 : index
    %31 = vector.load %arg4[%c3, %c0_22] : memref<5x128xf32, #tpu.memory_space<vmem>>, vector<1x128xf32>
    %32 = vector.broadcast %31 : vector<1x128xf32> to vector<256x128xf32>
    %33 = arith.addf %30, %32 : vector<256x128xf32>
    %cst_23 = arith.constant 0.000000e+00 : f32
    %34 = vector.broadcast %cst_23 : f32 to vector<256x128xf32>
    %35 = arith.maximumf %33, %34 : vector<256x128xf32>
    %36 = arith.truncf %35 : vector<256x128xf32> to vector<256x128xbf16>
    %c3_24 = arith.constant 3 : index
    %c0_25 = arith.constant 0 : index
    %c0_26 = arith.constant 0 : index
    %37 = vector.load %arg3[%c3_24, %c0_25, %c0_26] : memref<4x128x128xbf16, #tpu.memory_space<vmem>>, vector<1x128x128xbf16>
    %38 = vector.shape_cast %37 : vector<1x128x128xbf16> to vector<128x128xbf16>
    %cst_27 = arith.constant dense<0.000000e+00> : vector<256x128xf32>
    %39 = tpu.matmul %36, %38, %cst_27 {dimension_numbers = #tpu.dot_dimension_numbers<[1], [0], [0], [1], [0, 0, 1, 1], [], []>} : vector<256x128xbf16>, vector<128x128xbf16>, vector<256x128xf32> -> vector<256x128xf32>
    %c4 = arith.constant 4 : index
    %c0_28 = arith.constant 0 : index
    %40 = vector.load %arg4[%c4, %c0_28] : memref<5x128xf32, #tpu.memory_space<vmem>>, vector<1x128xf32>
    %41 = vector.broadcast %40 : vector<1x128xf32> to vector<256x128xf32>
    %42 = arith.addf %39, %41 : vector<256x128xf32>
    %cst_29 = arith.constant 0.000000e+00 : f32
    %43 = vector.broadcast %cst_29 : f32 to vector<256x128xf32>
    %44 = arith.maximumf %42, %43 : vector<256x128xf32>
    %45 = vector.extract_strided_slice %44 {offsets = [0, 0], sizes = [256, 16], strides = [1, 1]} : vector<256x128xf32> to vector<256x16xf32>
    %c0_30 = arith.constant 0 : index
    %c0_31 = arith.constant 0 : index
    %46 = vector.load %arg5[%c0_30, %c0_31] : memref<256x16xf32, #tpu.memory_space<vmem>>, vector<256x16xf32>
    tpu.vector_store %arg5[%c0_30, %c0_31], %45 {strides = array<i32>} : memref<256x16xf32, #tpu.memory_space<vmem>>, vector<256x16xf32>,
    return
  }
  func.func @transform_0(%arg0: i32) -> (i32, i32) {
    %c0_i32 = arith.constant 0 : i32
    %c0_i32_0 = arith.constant 0 : i32
    return %arg0, %c0_i32 : i32, i32
  }
  func.func @transform_1(%arg0: i32) -> (i32, i32) {
    %c0_i32 = arith.constant 0 : i32
    %c0_i32_0 = arith.constant 0 : i32
    %c0_i32_1 = arith.constant 0 : i32
    return %c0_i32, %c0_i32_0 : i32, i32
  }
  func.func @transform_2(%arg0: i32) -> (i32, i32, i32) {
    %c0_i32 = arith.constant 0 : i32
    %c0_i32_0 = arith.constant 0 : i32
    %c0_i32_1 = arith.constant 0 : i32
    %c0_i32_2 = arith.constant 0 : i32
    return %c0_i32, %c0_i32_0, %c0_i32_1 : i32, i32, i32
  }
  func.func @transform_3(%arg0: i32) -> (i32, i32) {
    %c0_i32 = arith.constant 0 : i32
    %c0_i32_0 = arith.constant 0 : i32
    %c0_i32_1 = arith.constant 0 : i32
    return %c0_i32, %c0_i32_0 : i32, i32
  }
  func.func @transform_4(%arg0: i32) -> (i32, i32) {
    %c0_i32 = arith.constant 0 : i32
    %c0_i32_0 = arith.constant 0 : i32
    return %arg0, %c0_i32 : i32, i32
  }
}

</mosaic_0001>

<bundles_post_ra>
// kernel: tpu_custom_call.1
= control target key start
LH: loop header
LB: loop body
LE: loop exit
PB: predicated region body
PF: predicated region fallthrough
CT: control target
= control target key end

     0   :  { %s2730_s15 = smov 0   ;;  %s2732_s16 = smov 0   ;;  %s3325_s0 = inlined_call_operand.vmem [shape: f32[500,32], index: 0, kind: input, shape index: {}]   ;;  %s3326_s1 = inlined_call_operand.vmem [shape: bf16[32,128], index: 1, kind: input, shape index: {}]   ;;  %s3327_s2 = inlined_call_operand.vmem [shape: bf16[4,128,128], index: 2, kind: input, shape index: {}]   ;;  %s3328_s3 = inlined_call_operand.vmem [shape: f32[5,128], index: 3, kind: input, shape index: {}]   ;;  %s3329_s4 = inlined_call_operand.vmem [shape: f32[500,16], index: 4, kind: output, shape index: {}]  }
   0x1   :  { %s2734_s17 = smov 0  }
   0x2 LB: > { %s2743_s18 = sadd.s32 4294967295, %s2671_s17   ;;  %s2745_s19 = sadd.s32 1, %s2671_s17   ;;  %s2671_s17 = sphi %s2734_s17, %s3338_s17   ;;  %s2667_s16 = sphi %s2732_s16, %s3337_s16   ;;  %s2663_s15 = sphi %s2730_s15, %s3336_s15  }
   0x3   : > { %s107_s20 = ssub.s32 %s2671_s17, %s2745_s19  ;;  %s110_s21 = sadd.s32 1, %s2667_s16 }
   0x4   : > { %p108_p0 = scmp.eq.s32.totalorder %s107_s20, 0  ;;  %p120_p1 = scmp.ne.s32.totalorder %s2667_s16, %s2663_s15 }
   0x5   : > { %p121_p2 = scmp.eq.s32.totalorder %s2743_s18, 1  ;;  %p2022_p3 = scmp.ge.s32.totalorder %s2671_s17, 1 }
   0x6   : > { %s2753_s22 = scalar_select %p108_p0, %s2667_s16, %s110_s21  }
   0x7   : > { %p2755_p4 = por %p121_p2, %p120_p1  ;;  %p171_p5 = scmp.lt.s32.totalorder %s2671_s17, 3 }
   0x9   : > { %p172_p6 = pnand %p2022_p3, %p171_p5 }
   0xa   : > { %s2763_s26 = sshll.u32 (!%p172_p6), %s2743_s18, 5  ;;  %s197_s30 = sand.u32 (!%p172_p6), 1, %s2663_s15  }
   0xb   : > { %175 = sbr.rel (%p172_p6) target bundleno = 1157 (0x485), region = 36  ;;  %p205_p7 = scmp.lt.s32.totalorder (!%p172_p6), %s2763_s26, 62 }
   0xc   : > { %s2023_s7 = sshll.u32 (!%p172_p6), %s197_s30, 8 }
   0xd   : > { %s3090_s8 = scalar_lea.vmem (!%p172_p6), [#allocation2], %s2023_s7  }
  0x10   : > { %v2583_v0 = vld [vmem:[%s3326_s1 + $0x8] sm:$0xff]   ;;  %v2584_v1 = vld [vmem:[%s3326_s1] sm:$0xff]   ;;  %s206_s29 = scalar_select %p205_p7, %s2763_s26, 62  ;;  %v2585_v2 = vld [vmem:[%s3327_s2 + $0x38] sm:$0xff]   ;;  %vm289_vm0 = vcmask 261120   ;;  %vm1646_vm1 = vcmask 130048  }
  0x11   : > { %2263 = vmatprep.subr.bf16.mxu0 %v2583_v0  ;;  %2491 = vmatprep.subr.bf16.mxu1 %v2583_v0  ;;  %v2586_v24 = vld [vmem:[%s3327_s2 + $0x30] sm:$0xff]   ;;  %v2587_v30 = vld [vmem:[%s3327_s2 + $0x28] sm:$0xff]   ;;  %v2588_v38 = vld [vmem:[%s3327_s2 + $0x20] sm:$0xff]   ;;  %s1687_s15 = ssub.s32 (%p2755_p4), 63, %s2763_s26 }
  0x12   : > { %2264 = vmatpush3.bf16.msra.mxu0 %v2583_v0  ;;  %2493 = vmatpush3.bf16.msra.mxu1 %v2583_v0  ;;  %s2025_s6 = sshll.u32 %s206_s29, 3  ;;  %v2589_v46 = vld [vmem:[%s3327_s2 + $0x18] sm:$0xff]   ;;  %v2590_v55 = vld [vmem:[%s3327_s2 + $0x10] sm:$0xff]   ;;  %v2591_v56 = vld [vmem:[%s3327_s2 + $0x8] sm:$0xff]   ;;  %p1688_p8 = scmp.lt.s32.totalorder (%p2755_p4), %s1687_s15, 32 }
  0x13   : > { %2265 = vmatprep.subr.bf16.mxu0 %v2584_v1  ;;  %2492 = vmatprep.subr.bf16.mxu1 %v2584_v1  ;;  %s2776_s9 = scalar_lea.vmem %s3325_s0, %s2025_s6  ;;  %v2592_v57 = vld [vmem:[%s3327_s2] sm:$0xff]   ;;  %v2593_v58 = vld [vmem:[%s3327_s2 + $0x78] sm:$0xff]   ;;  %v2594_v59 = vld [vmem:[%s3327_s2 + $0x70] sm:$0xff]  }
  0x14   : > { %v220_v3 = vld [vmem:[%s2776_s9] sm:$0xff]  ;;  %v221_v4 = vld [vmem:[%s2776_s9 + $0x8] sm:$0xff]  ;;  %v222_v5 = vld [vmem:[%s2776_s9 + $0x10] sm:$0xff] }
  0x15   : > { %v252_v6 = vpack.c.bf16 %v221_v4, %v220_v3  ;;  %v223_v7 = vld [vmem:[%s2776_s9 + $0x18] sm:$0xff]  ;;  %v224_v8 = vld [vmem:[%s2776_s9 + $0x20] sm:$0xff]  ;;  %v225_v9 = vld [vmem:[%s2776_s9 + $0x28] sm:$0xff] }
  0x16   : > { %2266 = vmatpush3.bf16.msra.mxu0 %v2584_v1  ;;  %2494 = vmatpush3.bf16.msra.mxu1 %v2584_v1  ;;  %v253_v10 = vpack.c.bf16 %v223_v7, %v222_v5  ;;  %v254_v11 = vpack.c.bf16 %v225_v9, %v224_v8  ;;  %v226_v12 = vld [vmem:[%s2776_s9 + $0x30] sm:$0xff]  ;;  %v227_v13 = vld [vmem:[%s2776_s9 + $0x38] sm:$0xff]  ;;  %v228_v14 = vld [vmem:[%s2776_s9 + $0x40] sm:$0xff] }
  0x17   : > { %2299 = vmatprep.subr.bf16.mxu1 %v2585_v2  ;;  %2267 = vmatprep.mubr.msk.bf16.mxu0 %vm289_vm0, %v252_v6  ;;  %v229_v15 = vld [vmem:[%s2776_s9 + $0x48] sm:$0xff]  ;;  %v236_v16 = vld [vmem:[%s2776_s9 + $0x80] sm:$0xff]  ;;  %v238_v19 = vld [vmem:[%s2776_s9 + $0x90] sm:$0xff]  ;;  %v255_v25 = vpack.c.bf16 %v227_v13, %v226_v12 }
  0x18   : > { %v237_v17 = vld [vmem:[%s2776_s9 + $0x88] sm:$0xff]  ;;  %v239_v20 = vld [vmem:[%s2776_s9 + $0x98] sm:$0xff]  ;;  %v240_v21 = vld [vmem:[%s2776_s9 + $0xa0] sm:$0xff]  ;;  %v256_v27 = vpack.c.bf16 %v229_v15, %v228_v14  ;;  %2347 = vmatprep.subr.bf16.mxu0 %v2593_v58 }
  0x19   : > { %2268 = vmatmul.mubr.msk.bf16.vlgmr.msra.gmra.mxu0 %vm289_vm0, %v253_v10  ;;  %v260_v18 = vpack.c.bf16 %v237_v17, %v236_v16  ;;  %v261_v22 = vpack.c.bf16 %v239_v20, %v238_v19  ;;  %v241_v23 = vld [vmem:[%s2776_s9 + $0xa8] sm:$0xff]  ;;  %v242_v28 = vld [vmem:[%s2776_s9 + $0xb0] sm:$0xff]  ;;  %v243_v29 = vld [vmem:[%s2776_s9 + $0xb8] sm:$0xff] }
  0x1a   : > { %2271 = vmatprep.mubr.msk.bf16.mxu0 %vm289_vm0, %v254_v11  ;;  %v262_v26 = vpack.c.bf16 %v241_v23, %v240_v21  ;;  %v244_v31 = vld [vmem:[%s2776_s9 + $0xc0] sm:$0xff]  ;;  %v245_v32 = vld [vmem:[%s2776_s9 + $0xc8] sm:$0xff]  ;;  %v230_v33 = vld [vmem:[%s2776_s9 + $0x50] sm:$0xff]  ;;  %v263_v37 = vpack.c.bf16 %v243_v29, %v242_v28  ;;  %2348 = vmatpush3.bf16.msra.mxu0 %v2593_v58 }
  0x1b   : > { %2283 = vmatprep.mubr.msk.bf16.mxu1 %vm289_vm0, %v260_v18  ;;  %v231_v34 = vld [vmem:[%s2776_s9 + $0x58] sm:$0xff]  ;;  %v232_v35 = vld [vmem:[%s2776_s9 + $0x60] sm:$0xff]  ;;  %v233_v36 = vld [vmem:[%s2776_s9 + $0x68] sm:$0xff]  ;;  %v264_v39 = vpack.c.bf16 %v245_v32, %v244_v31  ;;  %2349 = vmatprep.subr.bf16.mxu0 %v2594_v59 }
  0x1c   : > { %2284 = vmatmul.mubr.msk.bf16.vlgmr.msra.gmra.mxu1 %vm289_vm0, %v261_v22  ;;  %v257_v40 = vpack.c.bf16 %v231_v34, %v230_v33  ;;  %v246_v41 = vld [vmem:[%s2776_s9 + $0xd0] sm:$0xff]  ;;  %v247_v42 = vld [vmem:[%s2776_s9 + $0xd8] sm:$0xff]  ;;  %v258_v43 = vpack.c.bf16 %v233_v36, %v232_v35  ;;  %v248_v44 = vld [vmem:[%s2776_s9 + $0xe0] sm:$0xff] }
  0x1d   : > { %2287 = vmatprep.mubr.msk.bf16.mxu1 %vm289_vm0, %v262_v26  ;;  %2300 = vmatpush3.bf16.msra.mxu1 %v2585_v2  ;;  %v249_v45 = vld [vmem:[%s2776_s9 + $0xe8] sm:$0xff]  ;;  %v234_v47 = vld [vmem:[%s2776_s9 + $0x70] sm:$0xff]  ;;  %v235_v48 = vld [vmem:[%s2776_s9 + $0x78] sm:$0xff]  ;;  %v265_v49 = vpack.c.bf16 %v247_v42, %v246_v41 }
  0x1e   : > { %2301 = vmatprep.subr.bf16.mxu1 %v2586_v24  ;;  %v266_v50 = vpack.c.bf16 %v249_v45, %v248_v44  ;;  %v259_v51 = vpack.c.bf16 %v235_v48, %v234_v47  ;;  %v250_v52 = vld [vmem:[%s2776_s9 + $0xf0] sm:$0xff]  ;;  %v251_v53 = vld [vmem:[%s2776_s9 + $0xf8] sm:$0xff]  ;;  %v2595_v60 = vld [vmem:[%s3327_s2 + $0x68] sm:$0xff]   ;;  %2350 = vmatpush3.bf16.msra.mxu0 %v2594_v59  ;;  %s2146_s9 = sshll.u32 (%p2755_p4), %s2743_s18, 8 }
  0x1f   : > { %v267_v54 = vpack.c.bf16 %v251_v53, %v250_v52  ;;  %2351 = vmatprep.subr.bf16.mxu0 %v2595_v60  ;;  %v2596_v61 = vld [vmem:[%s3327_s2 + $0x60] sm:$0xff]   ;;  %v2597_v62 = vld [vmem:[%s3327_s2 + $0x58] sm:$0xff]   ;;  %s3193_s12 = scalar_lea.vmem (%p2755_p4), %s3329_s4, %s2146_s9  }
  0x20   : > { %v2865_v1 = vld [vmem:[%s3328_s3] ss:$0 sm:$0xff] }
  0x21   : > { %2272 = vmatmul.mubr.msk.bf16.gmra.mxu0 %vm289_vm0, %v255_v25  ;;  %2302 = vmatpush3.bf16.msra.mxu1 %v2586_v24 }
  0x22   : > { %2275 = vmatprep.mubr.msk.bf16.mxu0 %vm289_vm0, %v256_v27  ;;  %2303 = vmatprep.subr.bf16.mxu1 %v2587_v30 }
  0x23   : > { %2352 = vmatpush3.bf16.msra.mxu0 %v2595_v60 }
  0x24   : > { %2288 = vmatmul.mubr.msk.bf16.gmra.mxu1 %vm289_vm0, %v263_v37  ;;  %2353 = vmatprep.subr.bf16.mxu0 %v2596_v61 }
  0x25   : > { %2291 = vmatprep.mubr.msk.bf16.mxu1 %vm289_vm0, %v264_v39  ;;  %2304 = vmatpush3.bf16.msra.mxu1 %v2587_v30 }
  0x26   : > { %2305 = vmatprep.subr.bf16.mxu1 %v2588_v38 }
  0x27   : > { %2354 = vmatpush3.bf16.msra.mxu0 %v2596_v61 }
  0x28   : > { %2355 = vmatprep.subr.bf16.mxu0 %v2597_v62 }
  0x29   : > { %2276 = vmatmul.mubr.msk.bf16.gmra.mxu0 %vm289_vm0, %v257_v40  ;;  %2306 = vmatpush3.bf16.msra.mxu1 %v2588_v38 }
  0x2a   : > { %2279 = vmatprep.mubr.msk.bf16.mxu0 %vm289_vm0, %v258_v43  ;;  %2307 = vmatprep.subr.bf16.mxu1 %v2589_v46 }
  0x2b   : > { %2356 = vmatpush3.bf16.msra.mxu0 %v2597_v62 }
  0x2c   : > { %2292 = vmatmul.mubr.msk.bf16.gmra.mxu1 %vm289_vm0, %v265_v49 }
  0x2d   : > { %2295 = vmatprep.mubr.msk.bf16.mxu1 %vm289_vm0, %v266_v50  ;;  %2308 = vmatpush3.bf16.msra.mxu1 %v2589_v46 }
  0x2e   : > { %2309 = vmatprep.subr.bf16.mxu1 %v2590_v55 }
  0x31   : > { %2280 = vmatmul.mubr.msk.bf16.gmra.mxu0 %vm289_vm0, %v259_v51  ;;  %2310 = vmatpush3.bf16.msra.mxu1 %v2590_v55 }
  0x32   : > { %2311 = vmatprep.subr.bf16.mxu1 %v2591_v56 }
  0x34   : > { %2296 = vmatmul.mubr.msk.bf16.gmra.mxu1 %vm289_vm0, %v267_v54 }
  0x35   : > { %2312 = vmatpush3.bf16.msra.mxu1 %v2591_v56 }
  0x36   : > { %2313 = vmatprep.subr.bf16.mxu1 %v2592_v57 }
  0x39   : > { %2314 = vmatpush3.bf16.msra.mxu1 %v2592_v57 }
  0xd9   : > { %v2269_v63 = vpop.f32.mrf.mxu0 }
  0xda   : > { %v381_v6 = vadd.f32 %v2269_v63, %v2865_v1 }
  0xdb   : > { %v372_v0 = vpop.f32.mrf.mxu0 }
  0xdc   : > { %v373_v3 = vadd.f32 %v2865_v1, %v372_v0  ;;  %v2869_v5 = vpop.f32.mrf.mxu1  ;;  %v501_v15 = vmax.f32 %v381_v6, 0.0 }
  0xdd   : > { %v2270_v2 = vpop.f32.mrf.mxu0 }
  0xde   : > { %v384_v4 = vadd.f32 %v2270_v2, %v2865_v1  ;;  %v436_v9 = vpop.f32.mrf.mxu1  ;;  %v499_v12 = vmax.f32 %v373_v3, 0.0 }
  0xdf   : > { %v375_v7 = vpop.f32.mrf.mxu0  ;;  %v437_v53 = vadd.f32 %v2865_v1, %v436_v9 }
  0xe0   : > { %v376_v8 = vadd.f32 %v2865_v1, %v375_v7  ;;  %v502_v10 = vmax.f32 %v384_v4, 0.0  ;;  %v2873_v14 = vpop.f32.mrf.mxu1 }
  0xe1   : > { %v2273_v11 = vpop.f32.mrf.mxu0  ;;  %v515_v62 = vmax.f32 %v437_v53, 0.0  ;;  %v2603_v53 = vld [vmem:[%s3327_s2 + $0xa8] sm:$0xff]  }
  0xe2   : > { %v500_v13 = vmax.f32 %v376_v8, 0.0  ;;  %v439_v18 = vpop.f32.mrf.mxu1  ;;  %v532_v19 = vpack.c.bf16 %v502_v10, %v501_v15  ;;  %v397_v24 = vadd.f32 %v2273_v11, %v2865_v1  ;;  %v448_v15 = vadd.f32 %v2873_v14, %v2865_v1 }
  0xe3   : > { %v388_v16 = vpop.f32.mrf.mxu0  ;;  %v440_v54 = vadd.f32 %v2865_v1, %v439_v18 }
  0xe4   : > { %v531_v17 = vpack.c.bf16 %v500_v13, %v499_v12  ;;  %v389_v21 = vadd.f32 %v2865_v1, %v388_v16  ;;  %v2877_v23 = vpop.f32.mrf.mxu1  ;;  %v505_v33 = vmax.f32 %v397_v24, 0.0  ;;  %v445_v12 = vadd.f32 %v2869_v5, %v2865_v1 }
  0xe5   : > { %v2274_v20 = vpop.f32.mrf.mxu0  ;;  %v516_v0 = vmax.f32 %v440_v54, 0.0  ;;  %v461_v5 = vadd.f32 %v2877_v23, %v2865_v1  ;;  %v2604_v54 = vld [vmem:[%s3327_s2 + $0xa0] sm:$0xff]  }
  0xe6   : > { %v400_v22 = vadd.f32 %v2274_v20, %v2865_v1  ;;  %2315 = vmatprep.mubr.bf16.mxu1 %v531_v17  ;;  %v452_v27 = vpop.f32.mrf.mxu1  ;;  %v503_v30 = vmax.f32 %v389_v21, 0.0  ;;  %v518_v20 = vmax.f32 %v448_v15, 0.0 }
  0xe7   : > { %v391_v25 = vpop.f32.mrf.mxu0  ;;  %2316 = vmatmul.mubr.bf16.vlgmr.msra.gmra.mxu1 %v532_v19  ;;  %v539_v9 = vpack.c.bf16 %v516_v0, %v515_v62  ;;  %v453_v10 = vadd.f32 %v2865_v1, %v452_v27  ;;  %v517_v19 = vmax.f32 %v445_v12, 0.0 }
  0xe8   : > { %v392_v26 = vadd.f32 %v2865_v1, %v391_v25  ;;  %v506_v28 = vmax.f32 %v400_v22, 0.0  ;;  %v2881_v32 = vpop.f32.mrf.mxu1 }
  0xe9   : > { %v2277_v29 = vpop.f32.mrf.mxu0  ;;  %v519_v17 = vmax.f32 %v453_v10, 0.0  ;;  %v464_v14 = vadd.f32 %v2881_v32, %v2865_v1 }
  0xea   : > { %v504_v31 = vmax.f32 %v392_v26, 0.0  ;;  %v455_v36 = vpop.f32.mrf.mxu1  ;;  %v534_v37 = vpack.c.bf16 %v506_v28, %v505_v33  ;;  %v413_v42 = vadd.f32 %v2277_v29, %v2865_v1  ;;  %v540_v26 = vpack.c.bf16 %v518_v20, %v517_v19 }
  0xeb   : > { %v404_v34 = vpop.f32.mrf.mxu0  ;;  %v456_v11 = vadd.f32 %v2865_v1, %v455_v36 }
  0xec   : > { %v533_v35 = vpack.c.bf16 %v504_v31, %v503_v30  ;;  %v405_v39 = vadd.f32 %v2865_v1, %v404_v34  ;;  %v2885_v41 = vpop.f32.mrf.mxu1  ;;  %v509_v50 = vmax.f32 %v413_v42, 0.0  ;;  %v521_v30 = vmax.f32 %v461_v5, 0.0 }
  0xed   : > { %v2278_v38 = vpop.f32.mrf.mxu0  ;;  %v520_v18 = vmax.f32 %v456_v11, 0.0  ;;  %v522_v31 = vmax.f32 %v464_v14, 0.0  ;;  %v477_v23 = vadd.f32 %v2885_v41, %v2865_v1  ;;  %v2598_v41 = vld [vmem:[%s3327_s2 + $0x50] sm:$0xff]  }
  0xee   : > { %v416_v40 = vadd.f32 %v2278_v38, %v2865_v1  ;;  %2319 = vmatprep.mubr.bf16.mxu1 %v533_v35  ;;  %v468_v47 = vpop.f32.mrf.mxu1  ;;  %v507_v48 = vmax.f32 %v405_v39, 0.0  ;;  %2357 = vmatprep.subr.bf16.mxu0 %v2598_v41 }
  0xef   : > { %v407_v43 = vpop.f32.mrf.mxu0  ;;  %2320 = vmatmul.mubr.bf16.gmra.mxu1 %v534_v37  ;;  %v541_v22 = vpack.c.bf16 %v520_v18, %v519_v17  ;;  %v469_v24 = vadd.f32 %v2865_v1, %v468_v47  ;;  %v542_v37 = vpack.c.bf16 %v522_v31, %v521_v30  ;;  %2358 = vmatpush3.bf16.msra.mxu0 %v2598_v41 }
  0xf0   : > { %v408_v44 = vadd.f32 %v2865_v1, %v407_v43  ;;  %v510_v45 = vmax.f32 %v416_v40, 0.0  ;;  %v2294_v57 = vpop.f32.mrf.mxu1  ;;  %v525_v40 = vmax.f32 %v477_v23, 0.0 }
  0xf1   : > { %v2281_v46 = vpop.f32.mrf.mxu0  ;;  %v523_v28 = vmax.f32 %v469_v24, 0.0  ;;  %v480_v38 = vadd.f32 %v2294_v57, %v2865_v1  ;;  %v2607_v57 = vld [vmem:[%s3327_s2 + $0x88] sm:$0xff]  }
  0xf2   : > { %v508_v49 = vmax.f32 %v408_v44, 0.0  ;;  %v536_v55 = vpack.c.bf16 %v510_v45, %v509_v50  ;;  %v429_v60 = vadd.f32 %v2281_v46, %v2865_v1  ;;  %v471_v3 = vpop.f32.mrf.mxu1  ;;  %v2599_v50 = vld [vmem:[%s3327_s2 + $0x48] sm:$0xff]  }
  0xf3   : > { %v420_v51 = vpop.f32.mrf.mxu0  ;;  %v472_v25 = vadd.f32 %v2865_v1, %v471_v3  ;;  %v526_v42 = vmax.f32 %v480_v38, 0.0  ;;  %2359 = vmatprep.subr.bf16.mxu0 %v2599_v50 }
  0xf4   : > { %v535_v52 = vpack.c.bf16 %v508_v49, %v507_v48  ;;  %v421_v58 = vadd.f32 %v2865_v1, %v420_v51  ;;  %v513_v7 = vmax.f32 %v429_v60, 0.0  ;;  %v2297_v16 = vpop.f32.mrf.mxu1  ;;  %2360 = vmatpush3.bf16.msra.mxu0 %v2599_v50  ;;  %v2601_v51 = vld [vmem:[%s3327_s2 + $0xb8] sm:$0xff]   ;;  %v2947_v60 = vld [vmem:[%s3328_s3 + $0x1] ss:$0 sm:$0xff] }
  0xf5   : > { %v2282_v56 = vpop.f32.mrf.mxu0  ;;  %v524_v29 = vmax.f32 %v472_v25, 0.0  ;;  %v544_v44 = vpack.c.bf16 %v526_v42, %v525_v40  ;;  %v493_v45 = vadd.f32 %v2297_v16, %v2865_v1  ;;  %2395 = vmatprep.subr.bf16.mxu1 %v2601_v51 }
  0xf6   : > { %v432_v59 = vadd.f32 %v2282_v56, %v2865_v1  ;;  %2323 = vmatprep.mubr.bf16.mxu1 %v535_v52  ;;  %v511_v4 = vmax.f32 %v421_v58, 0.0  ;;  %v484_v21 = vpop.f32.mrf.mxu1  ;;  %v2602_v52 = vld [vmem:[%s3327_s2 + $0xb0] sm:$0xff]   ;;  %2396 = vmatpush3.bf16.msra.mxu1 %v2601_v51 }
  0xf7   : > { %v423_v61 = vpop.f32.mrf.mxu0  ;;  %2324 = vmatmul.mubr.bf16.gmra.mxu1 %v536_v55  ;;  %v543_v34 = vpack.c.bf16 %v524_v29, %v523_v28  ;;  %v485_v35 = vadd.f32 %v2865_v1, %v484_v21  ;;  %v529_v47 = vmax.f32 %v493_v45, 0.0  ;;  %2397 = vmatprep.subr.bf16.mxu1 %v2602_v52  ;;  %v2605_v55 = vld [vmem:[%s3327_s2 + $0x98] sm:$0xff]   ;;  %v2606_v56 = vld [vmem:[%s3327_s2 + $0x90] sm:$0xff]  }
  0xf8   : > { %v424_v63 = vadd.f32 %v2865_v1, %v423_v61  ;;  %v514_v2 = vmax.f32 %v432_v59, 0.0  ;;  %v2298_v27 = vpop.f32.mrf.mxu1 }
  0xf9   : > { %v527_v32 = vmax.f32 %v485_v35, 0.0  ;;  %v496_v46 = vadd.f32 %v2298_v27, %v2865_v1 }
  0xfa   : > { %v512_v6 = vmax.f32 %v424_v63, 0.0  ;;  %v538_v13 = vpack.c.bf16 %v514_v2, %v513_v7  ;;  %v487_v33 = vpop.f32.mrf.mxu1  ;;  %2398 = vmatpush3.bf16.msra.mxu1 %v2602_v52 }
  0xfb   : > { %v488_v36 = vadd.f32 %v2865_v1, %v487_v33  ;;  %v530_v48 = vmax.f32 %v496_v46, 0.0  ;;  %v2600_v1 = vld [vmem:[%s3327_s2 + $0x40] sm:$0xff]   ;;  %2399 = vmatprep.subr.bf16.mxu1 %v2603_v53 }
  0xfc   : > { %v537_v8 = vpack.c.bf16 %v512_v6, %v511_v4  ;;  %2361 = vmatprep.subr.bf16.mxu0 %v2600_v1 }
  0xfd   : > { %v528_v39 = vmax.f32 %v488_v36, 0.0  ;;  %v546_v49 = vpack.c.bf16 %v530_v48, %v529_v47  ;;  %2362 = vmatpush3.bf16.msra.mxu0 %v2600_v1 }
  0xfe   : > { %2327 = vmatprep.mubr.bf16.mxu1 %v537_v8  ;;  %2400 = vmatpush3.bf16.msra.mxu1 %v2603_v53 }
  0xff   : > { %2328 = vmatmul.mubr.bf16.gmra.mxu1 %v538_v13  ;;  %v545_v43 = vpack.c.bf16 %v528_v39, %v527_v32  ;;  %2401 = vmatprep.subr.bf16.mxu1 %v2604_v54 }
 0x100   : > { %2331 = vmatprep.mubr.bf16.mxu1 %v539_v9 }
 0x102   : > { %2402 = vmatpush3.bf16.msra.mxu1 %v2604_v54 }
 0x103   : > { %2403 = vmatprep.subr.bf16.mxu1 %v2605_v55 }
 0x106   : > { %2404 = vmatpush3.bf16.msra.mxu1 %v2605_v55 }
 0x107   : > { %2332 = vmatmul.mubr.bf16.gmra.mxu1 %v540_v26  ;;  %2405 = vmatprep.subr.bf16.mxu1 %v2606_v56 }
 0x108   : > { %2335 = vmatprep.mubr.bf16.mxu1 %v541_v22 }
 0x10a   : > { %2406 = vmatpush3.bf16.msra.mxu1 %v2606_v56 }
 0x10b   : > { %2407 = vmatprep.subr.bf16.mxu1 %v2607_v57 }
 0x10e   : > { %2408 = vmatpush3.bf16.msra.mxu1 %v2607_v57 }
 0x10f   : > { %2336 = vmatmul.mubr.bf16.gmra.mxu1 %v542_v37 }
 0x110   : > { %2339 = vmatprep.mubr.bf16.mxu1 %v543_v34 }
 0x117   : > { %2340 = vmatmul.mubr.bf16.gmra.mxu1 %v544_v44 }
 0x118   : > { %2343 = vmatprep.mubr.bf16.mxu1 %v545_v43 }
 0x11f   : > { %2344 = vmatmul.mubr.bf16.gmra.mxu1 %v546_v49 }
 0x1a7   : > { %v2317_v58 = vpop.f32.mrf.mxu1 }
 0x1a8   : > { %v659_v0 = vadd.f32 %v2317_v58, %v2947_v60 }
 0x1a9   : > { %v650_v59 = vpop.f32.mrf.mxu1 }
 0x1aa   : > { %v651_v62 = vadd.f32 %v2947_v60, %v650_v59  ;;  %v779_v9 = vmax.f32 %v659_v0, 0.0 }
 0x1ab   : > { %v2318_v61 = vpop.f32.mrf.mxu1 }
 0x1ac   : > { %v662_v63 = vadd.f32 %v2318_v61, %v2947_v60  ;;  %v777_v7 = vmax.f32 %v651_v62, 0.0 }
 0x1ad   : > { %v653_v2 = vpop.f32.mrf.mxu1 }
 0x1ae   : > { %v654_v3 = vadd.f32 %v2947_v60, %v653_v2  ;;  %v780_v4 = vmax.f32 %v662_v63, 0.0 }
 0x1af   : > { %v2321_v6 = vpop.f32.mrf.mxu1 }
 0x1b0   : > { %v778_v8 = vmax.f32 %v654_v3, 0.0  ;;  %v810_v12 = vpack.c.bf16 %v780_v4, %v779_v9  ;;  %v675_v17 = vadd.f32 %v2321_v6, %v2947_v60 }
 0x1b1   : > { %v666_v10 = vpop.f32.mrf.mxu1 }
 0x1b2   : > { %v809_v11 = vpack.c.bf16 %v778_v8, %v777_v7  ;;  %v667_v15 = vadd.f32 %v2947_v60, %v666_v10  ;;  %v783_v25 = vmax.f32 %v675_v17, 0.0 }
 0x1b3   : > { %v2322_v13 = vpop.f32.mrf.mxu1 }
 0x1b4   : > { %v678_v16 = vadd.f32 %v2322_v13, %v2947_v60  ;;  %2363 = vmatprep.mubr.bf16.mxu0 %v809_v11  ;;  %v781_v22 = vmax.f32 %v667_v15, 0.0 }
 0x1b5   : > { %v669_v18 = vpop.f32.mrf.mxu1  ;;  %2364 = vmatmul.mubr.bf16.vlgmr.msra.gmra.mxu0 %v810_v12 }
 0x1b6   : > { %v670_v19 = vadd.f32 %v2947_v60, %v669_v18  ;;  %v784_v20 = vmax.f32 %v678_v16, 0.0 }
 0x1b7   : > { %v2325_v21 = vpop.f32.mrf.mxu1 }
 0x1b8   : > { %v782_v24 = vmax.f32 %v670_v19, 0.0  ;;  %v812_v14 = vpack.c.bf16 %v784_v20, %v783_v25  ;;  %v691_v30 = vadd.f32 %v2325_v21, %v2947_v60 }
 0x1b9   : > { %v682_v26 = vpop.f32.mrf.mxu1 }
 0x1ba   : > { %v811_v5 = vpack.c.bf16 %v782_v24, %v781_v22  ;;  %v683_v28 = vadd.f32 %v2947_v60, %v682_v26  ;;  %v787_v23 = vmax.f32 %v691_v30, 0.0 }
 0x1bb   : > { %v2326_v27 = vpop.f32.mrf.mxu1 }
 0x1bc   : > { %v694_v29 = vadd.f32 %v2326_v27, %v2947_v60  ;;  %2367 = vmatprep.mubr.bf16.mxu0 %v811_v5  ;;  %v785_v36 = vmax.f32 %v683_v28, 0.0 }
 0x1bd   : > { %v685_v31 = vpop.f32.mrf.mxu1  ;;  %2368 = vmatmul.mubr.bf16.gmra.mxu0 %v812_v14 }
 0x1be   : > { %v686_v33 = vadd.f32 %v2947_v60, %v685_v31  ;;  %v788_v34 = vmax.f32 %v694_v29, 0.0 }
 0x1bf   : > { %v2329_v35 = vpop.f32.mrf.mxu1 }
 0x1c0   : > { %v786_v37 = vmax.f32 %v686_v33, 0.0  ;;  %v814_v39 = vpack.c.bf16 %v788_v34, %v787_v23  ;;  %v707_v44 = vadd.f32 %v2329_v35, %v2947_v60 }
 0x1c1   : > { %v698_v38 = vpop.f32.mrf.mxu1 }
 0x1c2   : > { %v813_v32 = vpack.c.bf16 %v786_v37, %v785_v36  ;;  %v699_v42 = vadd.f32 %v2947_v60, %v698_v38  ;;  %v791_v50 = vmax.f32 %v707_v44, 0.0 }
 0x1c3   : > { %v2330_v40 = vpop.f32.mrf.mxu1 }
 0x1c4   : > { %v710_v43 = vadd.f32 %v2330_v40, %v2947_v60  ;;  %2371 = vmatprep.mubr.bf16.mxu0 %v813_v32  ;;  %v789_v49 = vmax.f32 %v699_v42, 0.0 }
 0x1c5   : > { %v701_v45 = vpop.f32.mrf.mxu1  ;;  %2372 = vmatmul.mubr.bf16.gmra.mxu0 %v814_v39 }
 0x1c6   : > { %v702_v46 = vadd.f32 %v2947_v60, %v701_v45  ;;  %v792_v47 = vmax.f32 %v710_v43, 0.0 }
 0x1c7   : > { %v2333_v48 = vpop.f32.mrf.mxu1 }
 0x1c8   : > { %v790_v41 = vmax.f32 %v702_v46, 0.0  ;;  %v816_v52 = vpack.c.bf16 %v792_v47, %v791_v50  ;;  %v723_v56 = vadd.f32 %v2333_v48, %v2947_v60  ;;  %v2608_v46 = vld [vmem:[%s3327_s2 + $0x80] sm:$0xff]   ;;  %v2609_v47 = vld [vmem:[%s3327_s2 + $0xf8] sm:$0xff]   ;;  %v2611_v48 = vld [vmem:[%s3327_s2 + $0xe8] sm:$0xff]  }
 0x1c9   : > { %v714_v1 = vpop.f32.mrf.mxu1  ;;  %2409 = vmatprep.subr.bf16.mxu1 %v2608_v46  ;;  %2443 = vmatprep.subr.bf16.mxu0 %v2609_v47  ;;  %v2614_v50 = vld [vmem:[%s3327_s2 + $0xd0] sm:$0xff]  }
 0x1ca   : > { %v815_v51 = vpack.c.bf16 %v790_v41, %v789_v49  ;;  %v715_v54 = vadd.f32 %v2947_v60, %v714_v1  ;;  %v795_v0 = vmax.f32 %v723_v56, 0.0  ;;  %2410 = vmatpush3.bf16.msra.mxu1 %v2608_v46  ;;  %2444 = vmatpush3.bf16.msra.mxu0 %v2609_v47  ;;  %v2612_v49 = vld [vmem:[%s3327_s2 + $0xe0] sm:$0xff]   ;;  %v2613_v41 = vld [vmem:[%s3327_s2 + $0xd8] sm:$0xff]   ;;  %v2615_v1 = vld [vmem:[%s3327_s2 + $0xc8] sm:$0xff]  }
 0x1cb   : > { %v2334_v53 = vpop.f32.mrf.mxu1 }
 0x1cc   : > { %v726_v55 = vadd.f32 %v2334_v53, %v2947_v60  ;;  %2375 = vmatprep.mubr.bf16.mxu0 %v815_v51  ;;  %v793_v62 = vmax.f32 %v715_v54, 0.0  ;;  %v3008_v53 = vld [vmem:[%s3328_s3 + $0x2] ss:$0 sm:$0xff] }
 0x1cd   : > { %v717_v57 = vpop.f32.mrf.mxu1  ;;  %2376 = vmatmul.mubr.bf16.gmra.mxu0 %v816_v52 }
 0x1ce   : > { %v718_v58 = vadd.f32 %v2947_v60, %v717_v57  ;;  %v796_v59 = vmax.f32 %v726_v55, 0.0 }
 0x1cf   : > { %v2337_v61 = vpop.f32.mrf.mxu1 }
 0x1d0   : > { %v794_v63 = vmax.f32 %v718_v58, 0.0  ;;  %v818_v4 = vpack.c.bf16 %v796_v59, %v795_v0  ;;  %v739_v9 = vadd.f32 %v2337_v61, %v2947_v60 }
 0x1d1   : > { %v730_v2 = vpop.f32.mrf.mxu1 }
 0x1d2   : > { %v817_v3 = vpack.c.bf16 %v794_v63, %v793_v62  ;;  %v731_v7 = vadd.f32 %v2947_v60, %v730_v2  ;;  %v799_v17 = vmax.f32 %v739_v9, 0.0 }
 0x1d3   : > { %v2338_v6 = vpop.f32.mrf.mxu1 }
 0x1d4   : > { %v742_v8 = vadd.f32 %v2338_v6, %v2947_v60  ;;  %2379 = vmatprep.mubr.bf16.mxu0 %v817_v3  ;;  %v797_v15 = vmax.f32 %v731_v7, 0.0 }
 0x1d5   : > { %v733_v10 = vpop.f32.mrf.mxu1  ;;  %2380 = vmatmul.mubr.bf16.gmra.mxu0 %v818_v4 }
 0x1d6   : > { %v734_v11 = vadd.f32 %v2947_v60, %v733_v10  ;;  %v800_v12 = vmax.f32 %v742_v8, 0.0 }
 0x1d7   : > { %v2341_v13 = vpop.f32.mrf.mxu1 }
 0x1d8   : > { %v798_v16 = vmax.f32 %v734_v11, 0.0  ;;  %v820_v20 = vpack.c.bf16 %v800_v12, %v799_v17  ;;  %v755_v25 = vadd.f32 %v2341_v13, %v2947_v60 }
 0x1d9   : > { %v746_v18 = vpop.f32.mrf.mxu1 }
 0x1da   : > { %v819_v19 = vpack.c.bf16 %v798_v16, %v797_v15  ;;  %v747_v22 = vadd.f32 %v2947_v60, %v746_v18  ;;  %v803_v30 = vmax.f32 %v755_v25, 0.0 }
 0x1db   : > { %v2342_v21 = vpop.f32.mrf.mxu1 }
 0x1dc   : > { %v758_v24 = vadd.f32 %v2342_v21, %v2947_v60  ;;  %2383 = vmatprep.mubr.bf16.mxu0 %v819_v19  ;;  %v801_v28 = vmax.f32 %v747_v22, 0.0 }
 0x1dd   : > { %v749_v26 = vpop.f32.mrf.mxu1  ;;  %2384 = vmatmul.mubr.bf16.gmra.mxu0 %v820_v20 }
 0x1de   : > { %v750_v5 = vadd.f32 %v2947_v60, %v749_v26  ;;  %v804_v14 = vmax.f32 %v758_v24, 0.0 }
 0x1df   : > { %v2345_v27 = vpop.f32.mrf.mxu1 }
 0x1e0   : > { %v802_v29 = vmax.f32 %v750_v5, 0.0  ;;  %v822_v34 = vpack.c.bf16 %v804_v14, %v803_v30  ;;  %v771_v23 = vadd.f32 %v2345_v27, %v2947_v60 }
 0x1e1   : > { %v762_v31 = vpop.f32.mrf.mxu1 }
 0x1e2   : > { %v821_v33 = vpack.c.bf16 %v802_v29, %v801_v28  ;;  %v763_v36 = vadd.f32 %v2947_v60, %v762_v31  ;;  %v807_v43 = vmax.f32 %v771_v23, 0.0 }
 0x1e3   : > { %v2346_v35 = vpop.f32.mrf.mxu1 }
 0x1e4   : > { %v774_v37 = vadd.f32 %v2346_v35, %v2947_v60  ;;  %2387 = vmatprep.mubr.bf16.mxu0 %v821_v33  ;;  %v805_v40 = vmax.f32 %v763_v36, 0.0 }
 0x1e5   : > { %v765_v38 = vpop.f32.mrf.mxu1  ;;  %2388 = vmatmul.mubr.bf16.gmra.mxu0 %v822_v34 }
 0x1e6   : > { %v766_v32 = vadd.f32 %v2947_v60, %v765_v38  ;;  %v808_v39 = vmax.f32 %v774_v37, 0.0  ;;  %v2610_v60 = vld [vmem:[%s3327_s2 + $0xf0] sm:$0xff]  }
 0x1e7   : > { %2445 = vmatprep.subr.bf16.mxu0 %v2610_v60 }
 0x1e8   : > { %v806_v42 = vmax.f32 %v766_v32, 0.0  ;;  %v824_v45 = vpack.c.bf16 %v808_v39, %v807_v43  ;;  %2446 = vmatpush3.bf16.msra.mxu0 %v2610_v60 }
 0x1e9   : > { %2447 = vmatprep.subr.bf16.mxu0 %v2611_v48 }
 0x1ea   : > { %v823_v44 = vpack.c.bf16 %v806_v42, %v805_v40 }
 0x1ec   : > { %2391 = vmatprep.mubr.bf16.mxu0 %v823_v44  ;;  %2448 = vmatpush3.bf16.msra.mxu0 %v2611_v48 }
 0x1ed   : > { %2392 = vmatmul.mubr.bf16.gmra.mxu0 %v824_v45  ;;  %2449 = vmatprep.subr.bf16.mxu0 %v2612_v49 }
 0x1f0   : > { %2450 = vmatpush3.bf16.msra.mxu0 %v2612_v49 }
 0x1f1   : > { %2451 = vmatprep.subr.bf16.mxu0 %v2613_v41 }
 0x1f4   : > { %2452 = vmatpush3.bf16.msra.mxu0 %v2613_v41 }
 0x1f5   : > { %2453 = vmatprep.subr.bf16.mxu0 %v2614_v50 }
 0x1f8   : > { %2454 = vmatpush3.bf16.msra.mxu0 %v2614_v50 }
 0x1f9   : > { %2455 = vmatprep.subr.bf16.mxu0 %v2615_v1 }
 0x1fc   : > { %2456 = vmatpush3.bf16.msra.mxu0 %v2615_v1 }
 0x275   : > { %v2365_v51 = vpop.f32.mrf.mxu0 }
 0x276   : > { %v938_v57 = vadd.f32 %v2365_v51, %v3008_v53 }
 0x277   : > { %v929_v52 = vpop.f32.mrf.mxu0 }
 0x278   : > { %v930_v55 = vadd.f32 %v3008_v53, %v929_v52  ;;  %v1058_v2 = vmax.f32 %v938_v57, 0.0 }
 0x279   : > { %v2366_v54 = vpop.f32.mrf.mxu0 }
 0x27a   : > { %v941_v56 = vadd.f32 %v2366_v54, %v3008_v53  ;;  %v1056_v63 = vmax.f32 %v930_v55, 0.0 }
 0x27b   : > { %v932_v58 = vpop.f32.mrf.mxu0 }
 0x27c   : > { %v933_v59 = vadd.f32 %v3008_v53, %v932_v58  ;;  %v1059_v61 = vmax.f32 %v941_v56, 0.0 }
 0x27d   : > { %v2369_v62 = vpop.f32.mrf.mxu0 }
 0x27e   : > { %v1057_v0 = vmax.f32 %v933_v59, 0.0  ;;  %v1089_v6 = vpack.c.bf16 %v1059_v61, %v1058_v2  ;;  %v954_v10 = vadd.f32 %v2369_v62, %v3008_v53 }
 0x27f   : > { %v945_v3 = vpop.f32.mrf.mxu0 }
 0x280   : > { %v1088_v4 = vpack.c.bf16 %v1057_v0, %v1056_v63  ;;  %v946_v8 = vadd.f32 %v3008_v53, %v945_v3  ;;  %v1062_v18 = vmax.f32 %v954_v10, 0.0 }
 0x281   : > { %v2370_v7 = vpop.f32.mrf.mxu0 }
 0x282   : > { %v957_v9 = vadd.f32 %v2370_v7, %v3008_v53  ;;  %2411 = vmatprep.mubr.bf16.mxu1 %v1088_v4  ;;  %v1060_v16 = vmax.f32 %v946_v8, 0.0 }
 0x283   : > { %v948_v11 = vpop.f32.mrf.mxu0  ;;  %2412 = vmatmul.mubr.bf16.vlgmr.msra.gmra.mxu1 %v1089_v6 }
 0x284   : > { %v949_v12 = vadd.f32 %v3008_v53, %v948_v11  ;;  %v1063_v13 = vmax.f32 %v957_v9, 0.0 }
 0x285   : > { %v2373_v15 = vpop.f32.mrf.mxu0 }
 0x286   : > { %v1061_v17 = vmax.f32 %v949_v12, 0.0  ;;  %v1091_v21 = vpack.c.bf16 %v1063_v13, %v1062_v18  ;;  %v970_v26 = vadd.f32 %v2373_v15, %v3008_v53 }
 0x287   : > { %v961_v19 = vpop.f32.mrf.mxu0 }
 0x288   : > { %v1090_v20 = vpack.c.bf16 %v1061_v17, %v1060_v16  ;;  %v962_v24 = vadd.f32 %v3008_v53, %v961_v19  ;;  %v1066_v31 = vmax.f32 %v970_v26, 0.0 }
 0x289   : > { %v2374_v22 = vpop.f32.mrf.mxu0 }
 0x28a   : > { %v973_v25 = vadd.f32 %v2374_v22, %v3008_v53  ;;  %2415 = vmatprep.mubr.bf16.mxu1 %v1090_v20  ;;  %v1064_v29 = vmax.f32 %v962_v24, 0.0 }
 0x28b   : > { %v964_v5 = vpop.f32.mrf.mxu0  ;;  %2416 = vmatmul.mubr.bf16.gmra.mxu1 %v1091_v21 }
 0x28c   : > { %v965_v14 = vadd.f32 %v3008_v53, %v964_v5  ;;  %v1067_v27 = vmax.f32 %v973_v25, 0.0 }
 0x28d   : > { %v2377_v28 = vpop.f32.mrf.mxu0 }
 0x28e   : > { %v1065_v30 = vmax.f32 %v965_v14, 0.0  ;;  %v1093_v35 = vpack.c.bf16 %v1067_v27, %v1066_v31  ;;  %v986_v38 = vadd.f32 %v2377_v28, %v3008_v53 }
 0x28f   : > { %v977_v33 = vpop.f32.mrf.mxu0 }
 0x290   : > { %v1092_v34 = vpack.c.bf16 %v1065_v30, %v1064_v29  ;;  %v978_v37 = vadd.f32 %v3008_v53, %v977_v33  ;;  %v1070_v45 = vmax.f32 %v986_v38, 0.0 }
 0x291   : > { %v2378_v36 = vpop.f32.mrf.mxu0 }
 0x292   : > { %v989_v23 = vadd.f32 %v2378_v36, %v3008_v53  ;;  %2419 = vmatprep.mubr.bf16.mxu1 %v1092_v34  ;;  %v1068_v43 = vmax.f32 %v978_v37, 0.0 }
 0x293   : > { %v980_v32 = vpop.f32.mrf.mxu0  ;;  %2420 = vmatmul.mubr.bf16.gmra.mxu1 %v1093_v35 }
 0x294   : > { %v981_v39 = vadd.f32 %v3008_v53, %v980_v32  ;;  %v1071_v40 = vmax.f32 %v989_v23, 0.0 }
 0x295   : > { %v2381_v42 = vpop.f32.mrf.mxu0 }
 0x296   : > { %v1069_v44 = vmax.f32 %v981_v39, 0.0  ;;  %v1095_v60 = vpack.c.bf16 %v1071_v40, %v1070_v45  ;;  %v1002_v50 = vadd.f32 %v2381_v42, %v3008_v53  ;;  %v2616_v39 = vld [vmem:[%s3327_s2 + $0xc0] sm:$0xff]  }
 0x297   : > { %v993_v46 = vpop.f32.mrf.mxu0  ;;  %2457 = vmatprep.subr.bf16.mxu0 %v2616_v39 }
 0x298   : > { %v1094_v47 = vpack.c.bf16 %v1069_v44, %v1068_v43  ;;  %v994_v49 = vadd.f32 %v3008_v53, %v993_v46  ;;  %v1074_v57 = vmax.f32 %v1002_v50, 0.0  ;;  %2458 = vmatpush3.bf16.msra.mxu0 %v2616_v39 }
 0x299   : > { %v2382_v48 = vpop.f32.mrf.mxu0 }
 0x29a   : > { %v1005_v41 = vadd.f32 %v2382_v48, %v3008_v53  ;;  %2423 = vmatprep.mubr.bf16.mxu1 %v1094_v47  ;;  %v1072_v55 = vmax.f32 %v994_v49, 0.0 }
 0x29b   : > { %v996_v1 = vpop.f32.mrf.mxu0  ;;  %2424 = vmatmul.mubr.bf16.gmra.mxu1 %v1095_v60 }
 0x29c   : > { %v997_v51 = vadd.f32 %v3008_v53, %v996_v1  ;;  %v1075_v52 = vmax.f32 %v1005_v41, 0.0 }
 0x29d   : > { %v2385_v54 = vpop.f32.mrf.mxu0 }
 0x29e   : > { %v1073_v56 = vmax.f32 %v997_v51, 0.0  ;;  %v1097_v61 = vpack.c.bf16 %v1075_v52, %v1074_v57  ;;  %v1018_v2 = vadd.f32 %v2385_v54, %v3008_v53 }
 0x29f   : > { %v1009_v58 = vpop.f32.mrf.mxu0 }
 0x2a0   : > { %v1096_v59 = vpack.c.bf16 %v1073_v56, %v1072_v55  ;;  %v1010_v63 = vadd.f32 %v3008_v53, %v1009_v58  ;;  %v1078_v10 = vmax.f32 %v1018_v2, 0.0 }
 0x2a1   : > { %v2386_v62 = vpop.f32.mrf.mxu0 }
 0x2a2   : > { %v1021_v0 = vadd.f32 %v2386_v62, %v3008_v53  ;;  %2427 = vmatprep.mubr.bf16.mxu1 %v1096_v59  ;;  %v1076_v8 = vmax.f32 %v1010_v63, 0.0 }
 0x2a3   : > { %v1012_v3 = vpop.f32.mrf.mxu0  ;;  %2428 = vmatmul.mubr.bf16.gmra.mxu1 %v1097_v61 }
 0x2a4   : > { %v1013_v4 = vadd.f32 %v3008_v53, %v1012_v3  ;;  %v1079_v6 = vmax.f32 %v1021_v0, 0.0 }
 0x2a5   : > { %v2389_v7 = vpop.f32.mrf.mxu0 }
 0x2a6   : > { %v1077_v9 = vmax.f32 %v1013_v4, 0.0  ;;  %v1099_v13 = vpack.c.bf16 %v1079_v6, %v1078_v10  ;;  %v1034_v18 = vadd.f32 %v2389_v7, %v3008_v53 }
 0x2a7   : > { %v1025_v11 = vpop.f32.mrf.mxu0 }
 0x2a8   : > { %v1098_v12 = vpack.c.bf16 %v1077_v9, %v1076_v8  ;;  %v1026_v16 = vadd.f32 %v3008_v53, %v1025_v11  ;;  %v1082_v26 = vmax.f32 %v1034_v18, 0.0 }
 0x2a9   : > { %v2390_v15 = vpop.f32.mrf.mxu0 }
 0x2aa   : > { %v1037_v17 = vadd.f32 %v2390_v15, %v3008_v53  ;;  %2431 = vmatprep.mubr.bf16.mxu1 %v1098_v12  ;;  %v1080_v24 = vmax.f32 %v1026_v16, 0.0 }
 0x2ab   : > { %v1028_v19 = vpop.f32.mrf.mxu0  ;;  %2432 = vmatmul.mubr.bf16.gmra.mxu1 %v1099_v13 }
 0x2ac   : > { %v1029_v20 = vadd.f32 %v3008_v53, %v1028_v19  ;;  %v1083_v21 = vmax.f32 %v1037_v17, 0.0 }
 0x2ad   : > { %v2393_v22 = vpop.f32.mrf.mxu0 }
 0x2ae   : > { %v1081_v25 = vmax.f32 %v1029_v20, 0.0  ;;  %v1101_v27 = vpack.c.bf16 %v1083_v21, %v1082_v26  ;;  %v1050_v31 = vadd.f32 %v2393_v22, %v3008_v53 }
 0x2af   : > { %v1041_v5 = vpop.f32.mrf.mxu0 }
 0x2b0   : > { %v1100_v14 = vpack.c.bf16 %v1081_v25, %v1080_v24  ;;  %v1042_v29 = vadd.f32 %v3008_v53, %v1041_v5  ;;  %v1086_v23 = vmax.f32 %v1050_v31, 0.0 }
 0x2b1   : > { %v2394_v28 = vpop.f32.mrf.mxu0 }
 0x2b2   : > { %v1053_v30 = vadd.f32 %v2394_v28, %v3008_v53  ;;  %2435 = vmatprep.mubr.bf16.mxu1 %v1100_v14  ;;  %v1084_v36 = vmax.f32 %v1042_v29, 0.0 }
 0x2b3   : > { %v1044_v33 = vpop.f32.mrf.mxu0  ;;  %2436 = vmatmul.mubr.bf16.gmra.mxu1 %v1101_v27 }
 0x2b4   : > { %v1045_v34 = vadd.f32 %v3008_v53, %v1044_v33  ;;  %v1087_v35 = vmax.f32 %v1053_v30, 0.0  ;;  %v3048_v53 = vld [vmem:[%s3328_s3 + $0x3] ss:$0 sm:$0xff] }
 0x2b6   : > { %v1085_v37 = vmax.f32 %v1045_v34, 0.0  ;;  %v1103_v32 = vpack.c.bf16 %v1087_v35, %v1086_v23 }
 0x2b8   : > { %v1102_v38 = vpack.c.bf16 %v1085_v37, %v1084_v36 }
 0x2ba   : > { %2439 = vmatprep.mubr.bf16.mxu1 %v1102_v38 }
 0x2bb   : > { %2440 = vmatmul.mubr.bf16.gmra.mxu1 %v1103_v32 }
 0x343   : > { %v2413_v40 = vpop.f32.mrf.mxu1 }
 0x344   : > { %v1217_v46 = vadd.f32 %v2413_v40, %v3048_v53 }
 0x345   : > { %v1208_v42 = vpop.f32.mrf.mxu1 }
 0x346   : > { %v1209_v44 = vadd.f32 %v3048_v53, %v1208_v42  ;;  %v1337_v1 = vmax.f32 %v1217_v46, 0.0 }
 0x347   : > { %v2414_v43 = vpop.f32.mrf.mxu1 }
 0x348   : > { %v1220_v45 = vadd.f32 %v2414_v43, %v3048_v53  ;;  %v1335_v41 = vmax.f32 %v1209_v44, 0.0 }
 0x349   : > { %v1211_v47 = vpop.f32.mrf.mxu1 }
 0x34a   : > { %v1212_v60 = vadd.f32 %v3048_v53, %v1211_v47  ;;  %v1338_v48 = vmax.f32 %v1220_v45, 0.0 }
 0x34b   : > { %v2417_v49 = vpop.f32.mrf.mxu1 }
 0x34c   : > { %v1336_v50 = vmax.f32 %v1212_v60, 0.0  ;;  %v1368_v54 = vpack.c.bf16 %v1338_v48, %v1337_v1  ;;  %v1233_v58 = vadd.f32 %v2417_v49, %v3048_v53 }
 0x34d   : > { %v1224_v51 = vpop.f32.mrf.mxu1 }
 0x34e   : > { %v1367_v52 = vpack.c.bf16 %v1336_v50, %v1335_v41  ;;  %v1225_v56 = vadd.f32 %v3048_v53, %v1224_v51  ;;  %v1341_v3 = vmax.f32 %v1233_v58, 0.0 }
 0x34f   : > { %v2418_v55 = vpop.f32.mrf.mxu1 }
 0x350   : > { %v1236_v57 = vadd.f32 %v2418_v55, %v3048_v53  ;;  %2459 = vmatprep.mubr.bf16.mxu0 %v1367_v52  ;;  %v1339_v0 = vmax.f32 %v1225_v56, 0.0 }
 0x351   : > { %v1227_v59 = vpop.f32.mrf.mxu1  ;;  %2460 = vmatmul.mubr.bf16.vlgmr.msra.gmra.mxu0 %v1368_v54 }
 0x352   : > { %v1228_v61 = vadd.f32 %v3048_v53, %v1227_v59  ;;  %v1342_v62 = vmax.f32 %v1236_v57, 0.0 }
 0x353   : > { %v2421_v63 = vpop.f32.mrf.mxu1 }
 0x354   : > { %v1340_v2 = vmax.f32 %v1228_v61, 0.0  ;;  %v1370_v7 = vpack.c.bf16 %v1342_v62, %v1341_v3  ;;  %v1249_v11 = vadd.f32 %v2421_v63, %v3048_v53 }
 0x355   : > { %v1240_v4 = vpop.f32.mrf.mxu1 }
 0x356   : > { %v1369_v6 = vpack.c.bf16 %v1340_v2, %v1339_v0  ;;  %v1241_v9 = vadd.f32 %v3048_v53, %v1240_v4  ;;  %v1345_v19 = vmax.f32 %v1249_v11, 0.0 }
 0x357   : > { %v2422_v8 = vpop.f32.mrf.mxu1 }
 0x358   : > { %v1252_v10 = vadd.f32 %v2422_v8, %v3048_v53  ;;  %2463 = vmatprep.mubr.bf16.mxu0 %v1369_v6  ;;  %v1343_v17 = vmax.f32 %v1241_v9, 0.0 }
 0x359   : > { %v1243_v12 = vpop.f32.mrf.mxu1  ;;  %2464 = vmatmul.mubr.bf16.gmra.mxu0 %v1370_v7 }
 0x35a   : > { %v1244_v13 = vadd.f32 %v3048_v53, %v1243_v12  ;;  %v1346_v15 = vmax.f32 %v1252_v10, 0.0 }
 0x35b   : > { %v2425_v16 = vpop.f32.mrf.mxu1 }
 0x35c   : > { %v1344_v18 = vmax.f32 %v1244_v13, 0.0  ;;  %v1372_v22 = vpack.c.bf16 %v1346_v15, %v1345_v19  ;;  %v1265_v5 = vadd.f32 %v2425_v16, %v3048_v53 }
 0x35d   : > { %v1256_v20 = vpop.f32.mrf.mxu1 }
 0x35e   : > { %v1371_v21 = vpack.c.bf16 %v1344_v18, %v1343_v17  ;;  %v1257_v25 = vadd.f32 %v3048_v53, %v1256_v20  ;;  %v1349_v33 = vmax.f32 %v1265_v5, 0.0 }
 0x35f   : > { %v2426_v24 = vpop.f32.mrf.mxu1 }
 0x360   : > { %v1268_v26 = vadd.f32 %v2426_v24, %v3048_v53  ;;  %2467 = vmatprep.mubr.bf16.mxu0 %v1371_v21  ;;  %v1347_v30 = vmax.f32 %v1257_v25, 0.0 }
 0x361   : > { %v1259_v14 = vpop.f32.mrf.mxu1  ;;  %2468 = vmatmul.mubr.bf16.gmra.mxu0 %v1372_v22 }
 0x362   : > { %v1260_v27 = vadd.f32 %v3048_v53, %v1259_v14  ;;  %v1350_v28 = vmax.f32 %v1268_v26, 0.0 }
 0x363   : > { %v2429_v29 = vpop.f32.mrf.mxu1 }
 0x364   : > { %v1348_v31 = vmax.f32 %v1260_v27, 0.0  ;;  %v1374_v36 = vpack.c.bf16 %v1350_v28, %v1349_v33  ;;  %v1281_v32 = vadd.f32 %v2429_v29, %v3048_v53  ;;  %v3086_v27 = vld [vmem:[%s3328_s3 + $0x4] ss:$0 sm:$0xff] }
 0x365   : > { %v1272_v34 = vpop.f32.mrf.mxu1 }
 0x366   : > { %v1373_v35 = vpack.c.bf16 %v1348_v31, %v1347_v30  ;;  %v1273_v23 = vadd.f32 %v3048_v53, %v1272_v34  ;;  %v1353_v46 = vmax.f32 %v1281_v32, 0.0 }
 0x367   : > { %v2430_v37 = vpop.f32.mrf.mxu1 }
 0x368   : > { %v1284_v38 = vadd.f32 %v2430_v37, %v3048_v53  ;;  %2471 = vmatprep.mubr.bf16.mxu0 %v1373_v35  ;;  %v1351_v44 = vmax.f32 %v1273_v23, 0.0 }
 0x369   : > { %v1275_v39 = vpop.f32.mrf.mxu1  ;;  %2472 = vmatmul.mubr.bf16.gmra.mxu0 %v1374_v36 }
 0x36a   : > { %v1276_v40 = vadd.f32 %v3048_v53, %v1275_v39  ;;  %v1354_v42 = vmax.f32 %v1284_v38, 0.0 }
 0x36b   : > { %v2433_v43 = vpop.f32.mrf.mxu1 }
 0x36c   : > { %v1352_v45 = vmax.f32 %v1276_v40, 0.0  ;;  %v1376_v48 = vpack.c.bf16 %v1354_v42, %v1353_v46  ;;  %v1297_v1 = vadd.f32 %v2433_v43, %v3048_v53 }
 0x36d   : > { %v1288_v47 = vpop.f32.mrf.mxu1 }
 0x36e   : > { %v1375_v60 = vpack.c.bf16 %v1352_v45, %v1351_v44  ;;  %v1289_v41 = vadd.f32 %v3048_v53, %v1288_v47  ;;  %v1357_v58 = vmax.f32 %v1297_v1, 0.0 }
 0x36f   : > { %v2434_v49 = vpop.f32.mrf.mxu1 }
 0x370   : > { %v1300_v50 = vadd.f32 %v2434_v49, %v3048_v53  ;;  %2475 = vmatprep.mubr.bf16.mxu0 %v1375_v60  ;;  %v1355_v56 = vmax.f32 %v1289_v41, 0.0 }
 0x371   : > { %v1291_v51 = vpop.f32.mrf.mxu1  ;;  %2476 = vmatmul.mubr.bf16.gmra.mxu0 %v1376_v48 }
 0x372   : > { %v1292_v52 = vadd.f32 %v3048_v53, %v1291_v51  ;;  %v1358_v54 = vmax.f32 %v1300_v50, 0.0 }
 0x373   : > { %v2437_v55 = vpop.f32.mrf.mxu1 }
 0x374   : > { %v1356_v57 = vmax.f32 %v1292_v52, 0.0  ;;  %v1378_v62 = vpack.c.bf16 %v1358_v54, %v1357_v58  ;;  %v1313_v3 = vadd.f32 %v2437_v55, %v3048_v53 }
 0x375   : > { %v1304_v59 = vpop.f32.mrf.mxu1 }
 0x376   : > { %v1377_v61 = vpack.c.bf16 %v1356_v57, %v1355_v56  ;;  %v1305_v0 = vadd.f32 %v3048_v53, %v1304_v59  ;;  %v1361_v11 = vmax.f32 %v1313_v3, 0.0 }
 0x377   : > { %v2438_v63 = vpop.f32.mrf.mxu1 }
 0x378   : > { %v1316_v2 = vadd.f32 %v2438_v63, %v3048_v53  ;;  %2479 = vmatprep.mubr.bf16.mxu0 %v1377_v61  ;;  %v1359_v9 = vmax.f32 %v1305_v0, 0.0 }
 0x379   : > { %v1307_v4 = vpop.f32.mrf.mxu1  ;;  %2480 = vmatmul.mubr.bf16.gmra.mxu0 %v1378_v62 }
 0x37a   : > { %v1308_v6 = vadd.f32 %v3048_v53, %v1307_v4  ;;  %v1362_v7 = vmax.f32 %v1316_v2, 0.0 }
 0x37b   : > { %v2441_v8 = vpop.f32.mrf.mxu1 }
 0x37c   : > { %v1360_v10 = vmax.f32 %v1308_v6, 0.0  ;;  %v1380_v15 = vpack.c.bf16 %v1362_v7, %v1361_v11  ;;  %v1329_v19 = vadd.f32 %v2441_v8, %v3048_v53 }
 0x37d   : > { %v1320_v12 = vpop.f32.mrf.mxu1 }
 0x37e   : > { %v1379_v13 = vpack.c.bf16 %v1360_v10, %v1359_v9  ;;  %v1321_v17 = vadd.f32 %v3048_v53, %v1320_v12  ;;  %v1365_v26 = vmax.f32 %v1329_v19, 0.0 }
 0x37f   : > { %v2442_v16 = vpop.f32.mrf.mxu1 }
 0x380   : > { %v1332_v18 = vadd.f32 %v2442_v16, %v3048_v53  ;;  %2483 = vmatprep.mubr.bf16.mxu0 %v1379_v13  ;;  %v1363_v24 = vmax.f32 %v1321_v17, 0.0 }
 0x381   : > { %v1323_v20 = vpop.f32.mrf.mxu1  ;;  %2484 = vmatmul.mubr.bf16.gmra.mxu0 %v1380_v15 }
 0x382   : > { %v1324_v21 = vadd.f32 %v3048_v53, %v1323_v20  ;;  %v1366_v22 = vmax.f32 %v1332_v18, 0.0 }
 0x384   : > { %v1364_v25 = vmax.f32 %v1324_v21, 0.0  ;;  %v1382_v14 = vpack.c.bf16 %v1366_v22, %v1365_v26 }
 0x386   : > { %v1381_v5 = vpack.c.bf16 %v1364_v25, %v1363_v24 }
 0x388   : > { %2487 = vmatprep.mubr.bf16.mxu0 %v1381_v5 }
 0x389   : > { %2488 = vmatmul.mubr.bf16.gmra.mxu0 %v1382_v14 }
 0x411   : > { %v2461_v28 = vpop.f32.mrf.mxu0 }
 0x412   : > { %v1496_v29 = vadd.f32 %v2461_v28, %v3086_v27 }
 0x413   : > { %v1487_v53 = vpop.f32.mrf.mxu0 }
 0x414   : > { %v1616_v30 = vmax.f32 %v1496_v29, 0.0  ;;  %v1488_v31 = vadd.f32 %v3086_v27, %v1487_v53 }
 0x415   : > { %v2462_v33 = vpop.f32.mrf.mxu0 }
 0x416   : > { %1649 = vst.msk [vmem:[%s3090_s8 + $0x10] sm:$0xff] %vm1646_vm1, %v1616_v30  ;;  %v1614_v34 = vmax.f32 %v1488_v31, 0.0  ;;  %v1499_v35 = vadd.f32 %v2462_v33, %v3086_v27 }
 0x417   : > { %v1490_v36 = vpop.f32.mrf.mxu0 }
 0x418   : > { %1647 = vst.msk [vmem:[%s3090_s8] sm:$0xff] %vm1646_vm1, %v1614_v34  ;;  %v1617_v37 = vmax.f32 %v1499_v35, 0.0  ;;  %v1491_v23 = vadd.f32 %v3086_v27, %v1490_v36 }
 0x419   : > { %v2465_v38 = vpop.f32.mrf.mxu0 }
 0x41a   : > { %1650 = vst.msk [vmem:[%s3090_s8 + $0x18] sm:$0xff] %vm1646_vm1, %v1617_v37  ;;  %v1615_v32 = vmax.f32 %v1491_v23, 0.0  ;;  %v1512_v39 = vadd.f32 %v2465_v38, %v3086_v27 }
 0x41b   : > { %v1503_v40 = vpop.f32.mrf.mxu0 }
 0x41c   : > { %1648 = vst.msk [vmem:[%s3090_s8 + $0x8] sm:$0xff] %vm1646_vm1, %v1615_v32  ;;  %v1620_v42 = vmax.f32 %v1512_v39, 0.0  ;;  %v1504_v43 = vadd.f32 %v3086_v27, %v1503_v40 }
 0x41d   : > { %v2466_v44 = vpop.f32.mrf.mxu0 }
 0x41e   : > { %1653 = vst.msk [vmem:[%s3090_s8 + $0x30] sm:$0xff] %vm1646_vm1, %v1620_v42  ;;  %v1618_v45 = vmax.f32 %v1504_v43, 0.0  ;;  %v1515_v46 = vadd.f32 %v2466_v44, %v3086_v27 }
 0x41f   : > { %v1506_v47 = vpop.f32.mrf.mxu0 }
 0x420   : > { %1651 = vst.msk [vmem:[%s3090_s8 + $0x20] sm:$0xff] %vm1646_vm1, %v1618_v45  ;;  %v1621_v60 = vmax.f32 %v1515_v46, 0.0  ;;  %v1507_v48 = vadd.f32 %v3086_v27, %v1506_v47 }
 0x421   : > { %v2469_v49 = vpop.f32.mrf.mxu0 }
 0x422   : > { %1654 = vst.msk [vmem:[%s3090_s8 + $0x38] sm:$0xff] %vm1646_vm1, %v1621_v60  ;;  %v1619_v41 = vmax.f32 %v1507_v48, 0.0  ;;  %v1528_v50 = vadd.f32 %v2469_v49, %v3086_v27 }
 0x423   : > { %v1519_v1 = vpop.f32.mrf.mxu0 }
 0x424   : > { %1652 = vst.msk [vmem:[%s3090_s8 + $0x28] sm:$0xff] %vm1646_vm1, %v1619_v41  ;;  %v1624_v51 = vmax.f32 %v1528_v50, 0.0  ;;  %v1520_v52 = vadd.f32 %v3086_v27, %v1519_v1 }
 0x425   : > { %v2470_v54 = vpop.f32.mrf.mxu0 }
 0x426   : > { %1657 = vst.msk [vmem:[%s3090_s8 + $0x50] sm:$0xff] %vm1646_vm1, %v1624_v51  ;;  %v1622_v55 = vmax.f32 %v1520_v52, 0.0  ;;  %v1531_v56 = vadd.f32 %v2470_v54, %v3086_v27 }
 0x427   : > { %v1522_v57 = vpop.f32.mrf.mxu0 }
 0x428   : > { %1655 = vst.msk [vmem:[%s3090_s8 + $0x40] sm:$0xff] %vm1646_vm1, %v1622_v55  ;;  %v1625_v58 = vmax.f32 %v1531_v56, 0.0  ;;  %v1523_v59 = vadd.f32 %v3086_v27, %v1522_v57 }
 0x429   : > { %v2473_v61 = vpop.f32.mrf.mxu0 }
 0x42a   : > { %1658 = vst.msk [vmem:[%s3090_s8 + $0x58] sm:$0xff] %vm1646_vm1, %v1625_v58  ;;  %v1623_v62 = vmax.f32 %v1523_v59, 0.0  ;;  %v1544_v63 = vadd.f32 %v2473_v61, %v3086_v27 }
 0x42b   : > { %v1535_v0 = vpop.f32.mrf.mxu0 }
 0x42c   : > { %1656 = vst.msk [vmem:[%s3090_s8 + $0x48] sm:$0xff] %vm1646_vm1, %v1623_v62  ;;  %v1628_v2 = vmax.f32 %v1544_v63, 0.0  ;;  %v1536_v3 = vadd.f32 %v3086_v27, %v1535_v0 }
 0x42d   : > { %v2474_v4 = vpop.f32.mrf.mxu0 }
 0x42e   : > { %1661 = vst.msk [vmem:[%s3090_s8 + $0x70] sm:$0xff] %vm1646_vm1, %v1628_v2  ;;  %v1626_v6 = vmax.f32 %v1536_v3, 0.0  ;;  %v1547_v7 = vadd.f32 %v2474_v4, %v3086_v27 }
 0x42f   : > { %v1538_v8 = vpop.f32.mrf.mxu0 }
 0x430   : > { %1659 = vst.msk [vmem:[%s3090_s8 + $0x60] sm:$0xff] %vm1646_vm1, %v1626_v6  ;;  %v1629_v9 = vmax.f32 %v1547_v7, 0.0  ;;  %v1539_v10 = vadd.f32 %v3086_v27, %v1538_v8 }
 0x431   : > { %v2477_v11 = vpop.f32.mrf.mxu0 }
 0x432   : > { %1662 = vst.msk [vmem:[%s3090_s8 + $0x78] sm:$0xff] %vm1646_vm1, %v1629_v9  ;;  %v1627_v12 = vmax.f32 %v1539_v10, 0.0  ;;  %v1560_v13 = vadd.f32 %v2477_v11, %v3086_v27 }
 0x433   : > { %v1551_v15 = vpop.f32.mrf.mxu0 }
 0x434   : > { %1660 = vst.msk [vmem:[%s3090_s8 + $0x68] sm:$0xff] %vm1646_vm1, %v1627_v12  ;;  %v1632_v16 = vmax.f32 %v1560_v13, 0.0  ;;  %v1552_v17 = vadd.f32 %v3086_v27, %v1551_v15 }
 0x435   : > { %v2478_v18 = vpop.f32.mrf.mxu0 }
 0x436   : > { %1665 = vst.msk [vmem:[%s3090_s8 + $0x90] sm:$0xff] %vm1646_vm1, %v1632_v16  ;;  %v1630_v19 = vmax.f32 %v1552_v17, 0.0  ;;  %v1563_v20 = vadd.f32 %v2478_v18, %v3086_v27 }
 0x437   : > { %v1554_v21 = vpop.f32.mrf.mxu0 }
 0x438   : > { %1663 = vst.msk [vmem:[%s3090_s8 + $0x80] sm:$0xff] %vm1646_vm1, %v1630_v19  ;;  %v1633_v22 = vmax.f32 %v1563_v20, 0.0  ;;  %v1555_v24 = vadd.f32 %v3086_v27, %v1554_v21 }
 0x439   : > { %v2481_v25 = vpop.f32.mrf.mxu0 }
 0x43a   : > { %1666 = vst.msk [vmem:[%s3090_s8 + $0x98] sm:$0xff] %vm1646_vm1, %v1633_v22  ;;  %v1631_v26 = vmax.f32 %v1555_v24, 0.0  ;;  %v1576_v5 = vadd.f32 %v2481_v25, %v3086_v27 }
 0x43b   : > { %v1567_v14 = vpop.f32.mrf.mxu0 }
 0x43c   : > { %1664 = vst.msk [vmem:[%s3090_s8 + $0x88] sm:$0xff] %vm1646_vm1, %v1631_v26  ;;  %v1636_v28 = vmax.f32 %v1576_v5, 0.0  ;;  %v1568_v29 = vadd.f32 %v3086_v27, %v1567_v14 }
 0x43d   : > { %v2482_v53 = vpop.f32.mrf.mxu0 }
 0x43e   : > { %1669 = vst.msk [vmem:[%s3090_s8 + $0xb0] sm:$0xff] %vm1646_vm1, %v1636_v28  ;;  %v1634_v30 = vmax.f32 %v1568_v29, 0.0  ;;  %v1579_v31 = vadd.f32 %v2482_v53, %v3086_v27 }
 0x43f   : > { %v1570_v33 = vpop.f32.mrf.mxu0 }
 0x440   : > { %1667 = vst.msk [vmem:[%s3090_s8 + $0xa0] sm:$0xff] %vm1646_vm1, %v1634_v30  ;;  %v1637_v34 = vmax.f32 %v1579_v31, 0.0  ;;  %v1571_v35 = vadd.f32 %v3086_v27, %v1570_v33 }
 0x441   : > { %v2485_v36 = vpop.f32.mrf.mxu0 }
 0x442   : > { %1670 = vst.msk [vmem:[%s3090_s8 + $0xb8] sm:$0xff] %vm1646_vm1, %v1637_v34  ;;  %v1635_v37 = vmax.f32 %v1571_v35, 0.0  ;;  %v1592_v23 = vadd.f32 %v2485_v36, %v3086_v27 }
 0x443   : > { %v1583_v38 = vpop.f32.mrf.mxu0 }
 0x444   : > { %1668 = vst.msk [vmem:[%s3090_s8 + $0xa8] sm:$0xff] %vm1646_vm1, %v1635_v37  ;;  %v1640_v32 = vmax.f32 %v1592_v23, 0.0  ;;  %v1584_v39 = vadd.f32 %v3086_v27, %v1583_v38 }
 0x445   : > { %v2486_v40 = vpop.f32.mrf.mxu0 }
 0x446   : > { %1673 = vst.msk [vmem:[%s3090_s8 + $0xd0] sm:$0xff] %vm1646_vm1, %v1640_v32  ;;  %v1638_v42 = vmax.f32 %v1584_v39, 0.0  ;;  %v1595_v43 = vadd.f32 %v2486_v40, %v3086_v27 }
 0x447   : > { %v1586_v44 = vpop.f32.mrf.mxu0 }
 0x448   : > { %1671 = vst.msk [vmem:[%s3090_s8 + $0xc0] sm:$0xff] %vm1646_vm1, %v1638_v42  ;;  %v1641_v45 = vmax.f32 %v1595_v43, 0.0  ;;  %v1587_v46 = vadd.f32 %v3086_v27, %v1586_v44 }
 0x449   : > { %v2489_v47 = vpop.f32.mrf.mxu0 }
 0x44a   : > { %1674 = vst.msk [vmem:[%s3090_s8 + $0xd8] sm:$0xff] %vm1646_vm1, %v1641_v45  ;;  %v1639_v60 = vmax.f32 %v1587_v46, 0.0  ;;  %v1608_v48 = vadd.f32 %v2489_v47, %v3086_v27 }
 0x44b   : > { %v1599_v49 = vpop.f32.mrf.mxu0 }
 0x44c   : > { %1672 = vst.msk [vmem:[%s3090_s8 + $0xc8] sm:$0xff] %vm1646_vm1, %v1639_v60  ;;  %v1644_v41 = vmax.f32 %v1608_v48, 0.0  ;;  %v1600_v50 = vadd.f32 %v3086_v27, %v1599_v49 }
 0x44d   : > { %v2490_v1 = vpop.f32.mrf.mxu0 }
 0x44e   : > { %1677 = vst.msk [vmem:[%s3090_s8 + $0xf0] sm:$0xff] %vm1646_vm1, %v1644_v41  ;;  %v1642_v51 = vmax.f32 %v1600_v50, 0.0  ;;  %v1611_v52 = vadd.f32 %v2490_v1, %v3086_v27 }
 0x44f   : > { %v1602_v54 = vpop.f32.mrf.mxu0 }
 0x450   : > { %1675 = vst.msk [vmem:[%s3090_s8 + $0xe0] sm:$0xff] %vm1646_vm1, %v1642_v51  ;;  %v1645_v55 = vmax.f32 %v1611_v52, 0.0  ;;  %v1603_v56 = vadd.f32 %v3086_v27, %v1602_v54  ;;  %1685 = sbr.rel (!%p2755_p4) target bundleno = 1157 (0x485), region = 40 }
 0x452   : > { %1678 = vst.msk [vmem:[%s3090_s8 + $0xf8] sm:$0xff] %vm1646_vm1, %v1645_v55  ;;  %v1643_v57 = vmax.f32 %v1603_v56, 0.0 }
 0x454   : > { %1676 = vst.msk [vmem:[%s3090_s8 + $0xe8] sm:$0xff] %vm1646_vm1, %v1643_v57 }
 0x455   : > { %s3340_s15 = smov (!%p1688_p8, %s1687_s15), 32 }
 0x456   : > { %s2131_s13 = sshll.u32 %s3340_s15, 7 }
 0x457   : > { %p2134_p9 = scmp.eq.s32.totalorder %s2131_s13, 0 }
 0x458   : > { %s3199_s14 = sshrl.u32 (!%p2134_p9), %s3340_s15, 5 }
 0x459   : > { %1696 = sbr.rel (%p2134_p9) target bundleno = 1157 (0x485), region = 44  ;;  %p2135_p10 = scmp.le.s32.totalorder (!%p2134_p9), %s3199_s14, 0 }
 0x45e   : > { %1975 = sbr.rel (%p2135_p10) target bundleno = 1140 (0x474), region = 123  ;;  %s3331_s18 = smov (!%p2135_p10), %s3193_s12 }
 0x45f   : > { %s3332_s23 = smov (!%p2135_p10), %s3090_s8  ;;  %s3208_s26 = smov (!%p2135_p10), 0  }
 0x460   : > { %s3210_s17 = smov (!%p2135_p10), 0  }
 0x463 LB: >> { %v1821_v27 = vld [vmem:[%s2679_s23] sm:$0xff]  ;;  %v1823_v58 = vld [vmem:[%s2679_s23 + $0x8] sm:$0xff]  ;;  %v1825_v59 = vld [vmem:[%s2679_s23 + $0x10] sm:$0xff]  ;;  %s1885_s20 = sadd.s32 1, %s2683_s26  ;;  %s1815_s17 = sadd.s32 1, %s2687_s17   ;;  %s2687_s17 = sphi %s3210_s17, %s1815_s17   ;;  %s2683_s26 = sphi %s3208_s26, %s3335_s26   ;;  %s2679_s23 = sphi %s3332_s23, %s3334_s23   ;;  %s2675_s18 = sphi %s3331_s18, %s3333_s18  }
 0x464   : >> { %1822 = vst [vmem:[%s2675_s18] sm:$0xff] %v1821_v27  ;;  %1824 = vst [vmem:[%s2675_s18 + $0x8] sm:$0xff] %v1823_v58  ;;  %v1827_v61 = vld [vmem:[%s2679_s23 + $0x18] sm:$0xff]  ;;  %v1829_v62 = vld [vmem:[%s2679_s23 + $0x20] sm:$0xff]  ;;  %p1886_p11 = scmp.ge.s32.totalorder %s1885_s20, %s3199_s14  ;;  %p1814_p12 = scmp.ge.s32.totalorder %s1815_s17, %s3199_s14 }
 0x465   : >> { %1826 = vst [vmem:[%s2675_s18 + $0x10] sm:$0xff] %v1825_v59  ;;  %v1831_v63 = vld [vmem:[%s2679_s23 + $0x28] sm:$0xff]  ;;  %1828 = vst [vmem:[%s2675_s18 + $0x18] sm:$0xff] %v1827_v61  ;;  %v1833_v0 = vld [vmem:[%s2679_s23 + $0x30] sm:$0xff] }
 0x466   : >> { %1830 = vst [vmem:[%s2675_s18 + $0x20] sm:$0xff] %v1829_v62  ;;  %1832 = vst [vmem:[%s2675_s18 + $0x28] sm:$0xff] %v1831_v63  ;;  %v1835_v2 = vld [vmem:[%s2679_s23 + $0x38] sm:$0xff]  ;;  %v1837_v3 = vld [vmem:[%s2679_s23 + $0x40] sm:$0xff]  ;;  %s3342_s20 = smov (%p1886_p11, %s1885_s20), 0 }
 0x467   : >> { %1834 = vst [vmem:[%s2675_s18 + $0x30] sm:$0xff] %v1833_v0  ;;  %1836 = vst [vmem:[%s2675_s18 + $0x38] sm:$0xff] %v1835_v2  ;;  %v1839_v4 = vld [vmem:[%s2679_s23 + $0x48] sm:$0xff]  ;;  %v1841_v6 = vld [vmem:[%s2679_s23 + $0x50] sm:$0xff]  ;;  %s2136_s21 = sshll.u32 %s3342_s20, 8  ;;  %s3335_s26 = smov %s3342_s20 }
 0x468   : >> { %1838 = vst [vmem:[%s2675_s18 + $0x40] sm:$0xff] %v1837_v3  ;;  %v1843_v7 = vld [vmem:[%s2679_s23 + $0x58] sm:$0xff]  ;;  %1840 = vst [vmem:[%s2675_s18 + $0x48] sm:$0xff] %v1839_v4  ;;  %v1845_v8 = vld [vmem:[%s2679_s23 + $0x60] sm:$0xff]  ;;  %s3266_s24 = scalar_lea.vmem %s3090_s8, %s2136_s21 [#allocation2]   ;;  %s1891_s25 = scalar_lea.vmem %s3193_s12, %s2136_s21  }
 0x469   : >> { %1842 = vst [vmem:[%s2675_s18 + $0x50] sm:$0xff] %v1841_v6  ;;  %1844 = vst [vmem:[%s2675_s18 + $0x58] sm:$0xff] %v1843_v7  ;;  %v1847_v9 = vld [vmem:[%s2679_s23 + $0x68] sm:$0xff]  ;;  %v1849_v10 = vld [vmem:[%s2679_s23 + $0x70] sm:$0xff] }
 0x46a   : >> { %1846 = vst [vmem:[%s2675_s18 + $0x60] sm:$0xff] %v1845_v8  ;;  %1848 = vst [vmem:[%s2675_s18 + $0x68] sm:$0xff] %v1847_v9  ;;  %v1851_v11 = vld [vmem:[%s2679_s23 + $0x78] sm:$0xff]  ;;  %v1853_v12 = vld [vmem:[%s2679_s23 + $0x80] sm:$0xff] }
 0x46b   : >> { %1850 = vst [vmem:[%s2675_s18 + $0x70] sm:$0xff] %v1849_v10  ;;  %v1855_v13 = vld [vmem:[%s2679_s23 + $0x88] sm:$0xff]  ;;  %1852 = vst [vmem:[%s2675_s18 + $0x78] sm:$0xff] %v1851_v11  ;;  %v1857_v15 = vld [vmem:[%s2679_s23 + $0x90] sm:$0xff] }
 0x46c   : >> { %1854 = vst [vmem:[%s2675_s18 + $0x80] sm:$0xff] %v1853_v12  ;;  %1856 = vst [vmem:[%s2675_s18 + $0x88] sm:$0xff] %v1855_v13  ;;  %v1859_v16 = vld [vmem:[%s2679_s23 + $0x98] sm:$0xff]  ;;  %v1861_v17 = vld [vmem:[%s2679_s23 + $0xa0] sm:$0xff] }
 0x46d   : >> { %1858 = vst [vmem:[%s2675_s18 + $0x90] sm:$0xff] %v1857_v15  ;;  %1860 = vst [vmem:[%s2675_s18 + $0x98] sm:$0xff] %v1859_v16  ;;  %v1863_v18 = vld [vmem:[%s2679_s23 + $0xa8] sm:$0xff]  ;;  %v1865_v19 = vld [vmem:[%s2679_s23 + $0xb0] sm:$0xff] }
 0x46e   : >> { %1862 = vst [vmem:[%s2675_s18 + $0xa0] sm:$0xff] %v1861_v17  ;;  %v1867_v20 = vld [vmem:[%s2679_s23 + $0xb8] sm:$0xff]  ;;  %1864 = vst [vmem:[%s2675_s18 + $0xa8] sm:$0xff] %v1863_v18  ;;  %v1869_v21 = vld [vmem:[%s2679_s23 + $0xc0] sm:$0xff] }
 0x46f   : >> { %1866 = vst [vmem:[%s2675_s18 + $0xb0] sm:$0xff] %v1865_v19  ;;  %1868 = vst [vmem:[%s2675_s18 + $0xb8] sm:$0xff] %v1867_v20  ;;  %v1871_v22 = vld [vmem:[%s2679_s23 + $0xc8] sm:$0xff]  ;;  %v1873_v24 = vld [vmem:[%s2679_s23 + $0xd0] sm:$0xff]  ;;  %1817 = sbr.rel (!%p1814_p12) target bundleno = 1123 (0x463), region = 129 }
 0x470   : >> { %1870 = vst [vmem:[%s2675_s18 + $0xc0] sm:$0xff] %v1869_v21  ;;  %1872 = vst [vmem:[%s2675_s18 + $0xc8] sm:$0xff] %v1871_v22  ;;  %v1875_v25 = vld [vmem:[%s2679_s23 + $0xd8] sm:$0xff]  ;;  %v1877_v26 = vld [vmem:[%s2679_s23 + $0xe0] sm:$0xff] }
 0x471   : >> { %1874 = vst [vmem:[%s2675_s18 + $0xd0] sm:$0xff] %v1873_v24  ;;  %v1879_v5 = vld [vmem:[%s2679_s23 + $0xe8] sm:$0xff]  ;;  %1876 = vst [vmem:[%s2675_s18 + $0xd8] sm:$0xff] %v1875_v25  ;;  %v1881_v14 = vld [vmem:[%s2679_s23 + $0xf0] sm:$0xff] }
 0x472   : >> { %1878 = vst [vmem:[%s2675_s18 + $0xe0] sm:$0xff] %v1877_v26  ;;  %1880 = vst [vmem:[%s2675_s18 + $0xe8] sm:$0xff] %v1879_v5  ;;  %v1883_v28 = vld [vmem:[%s2679_s23 + $0xf8] sm:$0xff]  ;;  %s3334_s23 = smov %s3266_s24 }
 0x473   : >> { %1882 = vst [vmem:[%s2675_s18 + $0xf0] sm:$0xff] %v1881_v14  ;;  %1884 = vst [vmem:[%s2675_s18 + $0xf8] sm:$0xff] %v1883_v28  ;;  %s3333_s18 = smov %s1891_s25 }
 0x474 PF: > { %s3307_s27 = sand.u32 31, %s3340_s15   ;;  %s2147_s28 = sshll.u32 %s3199_s14, 8 }
 0x475   : > { %s1896_s29 = scalar_lea.vmem %s3090_s8, %s2147_s28 [#allocation2]   ;;  %s1898_s30 = scalar_lea.vmem %s3193_s12, %s2147_s28  }
 0x476   : > { %p2141_p13 = scmp.le.s32.totalorder %s3307_s27, 0 }
 0x477   : > { %s2689_s5 = smov (!%p2141_p13), %s1898_s30   ;;  %s2693_s6 = smov (!%p2141_p13), %s1896_s29  }
 0x478   : > { %1989 = sbr.rel (%p2141_p13) target bundleno = 1157 (0x485), region = 134  ;;  %s2697_s7 = smov (!%p2141_p13), 0  }
 0x479   : > { %s2701_s9 = smov (!%p2141_p13), 0  }
 0x47d LB: >> { %v1908_v29 = vld [vmem:[%s2695_s6] sm:$0xff]  ;;  %s1910_s15 = sadd.s32 1, %s2699_s7  ;;  %s1902_s9 = sadd.s32 1, %s2703_s9   ;;  %s2703_s9 = sphi %s2701_s9, %s1902_s9   ;;  %s2699_s7 = sphi %s2697_s7, %s2698_s7   ;;  %s2695_s6 = sphi %s2693_s6, %s1915_s6   ;;  %s2691_s5 = sphi %s2689_s5, %s1916_s5  }
 0x47e   : >> { %1909 = vst [vmem:[%s2691_s5] sm:$0xff] %v1908_v29  ;;  %p1911_p0 = scmp.ge.s32.totalorder %s1910_s15, %s3307_s27  ;;  %p1901_p1 = scmp.ge.s32.totalorder %s1902_s9, %s3307_s27 }
 0x480   : >> { %s3344_s15 = smov (%p1911_p0, %s1910_s15), 0  ;;  %1904 = sbr.rel (!%p1901_p1) target bundleno = 1149 (0x47d), region = 140 }
 0x481   : >> { %s2142_s8 = sshll.u32 %s3344_s15, 3  ;;  %s2698_s7 = smov %s3344_s15  }
 0x482   : >> { %s1915_s6 = scalar_lea.vmem %s1896_s29, %s2142_s8 [#allocation2]   ;;  %s1916_s5 = scalar_lea.vmem %s1898_s30, %s2142_s8  }
 0x485 PF: > { %p11_p2 = scmp.ge.s32.totalorder %s2745_s19, 4   ;;  %s3336_s15 = smov %s2667_s16 }
 0x486   : > { %s3337_s16 = smov %s2753_s22  ;;  %s3338_s17 = smov %s2745_s19 }
 0x487   :  { %13 = sbr.rel (!%p11_p2) target bundleno = 2 (0x2), region = 151 }

</bundles_post_ra>
